<compile_context>
chip_gen: v6e
topology: v6e:2x2x1
jax: 0.10.0
libtpu: 0.0.40
codegen_flags: <defaults>
</compile_context>

<pallas_src>
import functools

import jax
import jax.numpy as jnp
from jax import lax
from jax.experimental import pallas as pl
from jax.experimental.pallas import tpu as pltpu


# ----------------------------------------------------------------------------
# Fused Pallas kernel: one grid step == `nb` batch images
# ----------------------------------------------------------------------------
def _fused_bottleneck_kernel(x_ref, wr_ref, tr_ref, wc_ref, tc_ref,
                             wf_ref, tf_ref, o_ref, *, nb, ho):
    bf16 = jnp.bfloat16
    m = nb * ho                                   # rows per quadrant slab

    # x block: (1, 4*m, Wo*Cin) bf16 -- parity quadrants [EE,EO,OE,OO] of the
    # NHWC input, quadrant-major then image-major, Wo pixels folded into lanes.
    x = x_ref[0]                                  # (4*m, Wo*Cin)

    # --- conv_reduce (1x1) + folded-BN shift + ReLU --------------------------
    b1 = jnp.dot(x, wr_ref[...], preferred_element_type=jnp.float32)
    b1 = jnp.maximum(b1 + tr_ref[...], 0.0)       # (4*m, Wo*D) f32

    ee = b1[0 * m:1 * m]                          # input (2i  , 2j  )
    eo = b1[1 * m:2 * m]                          # input (2i  , 2j+1)
    oe = b1[2 * m:3 * m]                          # input (2i+1, 2j  )
    oo = b1[3 * m:4 * m]                          # input (2i+1, 2j+1)

    # kh=0 taps read the previous odd input row (zero padding at each image's
    # first output row).  Sublane roll (XLU) + iota mask (VPU) instead of
    # zero-row concats keeps this off the vld/vst slots.
    rows = lax.broadcasted_iota(jnp.int32, oe.shape, 0)
    top = (rows % ho) == 0
    oe_up = jnp.where(top, 0.0, pltpu.roll(oe, shift=1, axis=0))
    oo_up = jnp.where(top, 0.0, pltpu.roll(oo, shift=1, axis=0))

    # --- conv_conv (grouped 3x3, stride 2, pad 1) + BN + ReLU ----------------
    # im2col along the contraction axis only (horizontal taps folded into wc
    # on the host) -> one (m, 6*Wo*D) x (6*Wo*D, Wo*D) matmul, LHS in bf16.
    a = jnp.concatenate(
        [ee.astype(bf16), eo.astype(bf16), oe.astype(bf16), oo.astype(bf16),
         oe_up.astype(bf16), oo_up.astype(bf16)], axis=1)
    b2 = jnp.dot(a, wc_ref[...], preferred_element_type=jnp.float32)
    b2 = jnp.maximum(b2 + tc_ref[...], 0.0)       # (m, Wo*D) f32

    # --- conv_expand + BN  and  projection shortcut (1x1 stride 2) + BN ------
    # Fused into one matmul: LHS = [b2 | x_EE], RHS = [we ; ws].  The EE
    # quadrant of x is exactly x[:, ::2, ::2, :], i.e. the shortcut input.
    lhs = jnp.concatenate([b2.astype(bf16), x[0:m]], axis=1)
    out = jnp.dot(lhs, wf_ref[...], preferred_element_type=jnp.float32)
    o_ref[...] = jnp.maximum(out + tf_ref[...], 0.0)


# ----------------------------------------------------------------------------
# Wrapper: NCHW in -> NCHW out (host-side marshalling only)
# ----------------------------------------------------------------------------
def _pick_images_per_step(n, ho, max_rows=256):
    """Largest per-step batch with M = nb*Ho <= max MXU rows and grid >= 2."""
    best = 1
    for nb in range(1, n + 1):
        if n % nb:
            continue
        if nb * ho > max_rows:
            continue
        if n >= 2 and n // nb < 2:      # keep >= 2 steps so both v7x TCs work
            continue
        best = nb
    return best


def resnext_bottleneck_forward(x_nchw, p, *, stride, images_per_step=None):
    assert stride == 2, "fused kernel implemented for the stride=2 instantiation"
    N, Cin, H, W = x_nchw.shape
    Ho, Wo = H // stride, W // stride
    FCout = p["wf"].shape[1]                      # Wo * Cout
    Cout = FCout // Wo

    nb = images_per_step or _pick_images_per_step(N, Ho)
    assert N % nb == 0
    G = N // nb                                   # grid length
    M = nb * Ho                                   # matmul M for stages 2-3

    # Input marshalling (single pass over the input): NCHW -> NHWC, split into
    # stride-2 parity quadrants [EE, EO, OE, OO], fold Wo pixels into lanes,
    # cast to bf16 here (halves the kernel's input DMA, no in-kernel cast).
    x_nhwc = jnp.transpose(x_nchw, (0, 2, 3, 1))
    quads = jnp.stack(
        [x_nhwc[:, 0::2, 0::2, :], x_nhwc[:, 0::2, 1::2, :],
         x_nhwc[:, 1::2, 0::2, :], x_nhwc[:, 1::2, 1::2, :]], axis=0)
    xq = (quads.reshape(4, G, nb, Ho, Wo * Cin)
               .transpose(1, 0, 2, 3, 4)
               .reshape(G, 4 * M, Wo * Cin)
               .astype(jnp.bfloat16))

    kernel = functools.partial(_fused_bottleneck_kernel, nb=nb, ho=Ho)
    const = lambda i: (0, 0)                      # grid-invariant weights/biases
    out2d = pl.pallas_call(
        kernel,
        out_shape=jax.ShapeDtypeStruct((N * Ho, FCout), jnp.float32),
        grid=(G,),
        in_specs=[
            pl.BlockSpec((1, 4 * M, Wo * Cin), lambda i: (i, 0, 0)),
            pl.BlockSpec(p["wr"].shape, const),
            pl.BlockSpec(p["tr"].shape, const),
            pl.BlockSpec(p["wc"].shape, const),
            pl.BlockSpec(p["tc"].shape, const),
            pl.BlockSpec(p["wf"].shape, const),
            pl.BlockSpec(p["tf"].shape, const),
        ],
        out_specs=pl.BlockSpec((M, FCout), lambda i: (i, 0)),
        compiler_params=pltpu.CompilerParams(dimension_semantics=("parallel",)),
    )(xq, p["wr"], p["tr"], p["wc"], p["tc"], p["wf"], p["tf"])

    out = out2d.reshape(N, Ho, Wo, Cout)          # lane-dense output slab
    return jnp.transpose(out, (0, 3, 1, 2))       # NCHW (for the ref check)


# ----------------------------------------------------------------------------
# Deterministic parameter construction (kernel params + reference weights)
# ----------------------------------------------------------------------------
def make_params(key, in_channels, out_channels, stride, cardinality,
                widen_factor, H, W):
    D = cardinality * out_channels // widen_factor
    Cg = D // cardinality
    Wo = W // stride
    F = Wo                                        # pixels folded per row
    eps = 1e-5                                    # PyTorch BatchNorm2d default
    ks = jax.random.split(key, 20)

    def bn_fold(kg, kb, km, kv, C):
        gamma = 1.0 + 0.1 * jax.random.normal(kg, (C,), jnp.float32)
        beta = 0.1 * jax.random.normal(kb, (C,), jnp.float32)
        mean = 0.1 * jax.random.normal(km, (C,), jnp.float32)
        var = 1.0 + 0.1 * jnp.abs(jax.random.normal(kv, (C,), jnp.float32))
        scale = gamma / jnp.sqrt(var + eps)
        shift = beta - mean * scale
        return scale, shift

    w_reduce = 0.1 * jax.random.normal(ks[0], (in_channels, D), jnp.float32)
    s_red, t_red = bn_fold(ks[1], ks[2], ks[3], ks[4], D)
    w_group = 0.1 * jax.random.normal(ks[5], (3, 3, cardinality, Cg, Cg),
                                      jnp.float32)
    s_cv, t_cv = bn_fold(ks[6], ks[7], ks[8], ks[9], D)
    w_expand = 0.1 * jax.random.normal(ks[10], (D, out_channels), jnp.float32)
    s_ex, t_ex = bn_fold(ks[11], ks[12], ks[13], ks[14], out_channels)
    w_short = 0.1 * jax.random.normal(ks[15], (in_channels, out_channels),
                                      jnp.float32)
    s_sh, t_sh = bn_fold(ks[16], ks[17], ks[18], ks[19], out_channels)

    # Fold BN scale into weight columns, round once to bf16.  The same rounded
    # values feed both the kernel and the f32 reference, so the comparison
    # measures activation rounding / accumulation order only.
    wr_eff = (w_reduce * s_red[None, :]).astype(jnp.bfloat16)
    wg_eff = (w_group *
              s_cv.reshape(cardinality, Cg)[None, None, :, None, :]
              ).astype(jnp.bfloat16)
    we_eff = (w_expand * s_ex[None, :]).astype(jnp.bfloat16)
    ws_eff = (w_short * s_sh[None, :]).astype(jnp.bfloat16)

    # Dense (block-diagonal over groups) per-tap (D, D) weights, scale folded.
    wt = jnp.zeros((3, 3, D, D), jnp.float32)
    for g in range(cardinality):
        wt = wt.at[:, :, g * Cg:(g + 1) * Cg, g * Cg:(g + 1) * Cg].set(
            wg_eff[:, :, g].astype(jnp.float32))

    # Pixel-folded (Wo pixels per row) block-diagonal 1x1 weights.
    eyeF = jnp.eye(F, dtype=jnp.float32)
    wr_big = jnp.kron(eyeF, wr_eff.astype(jnp.float32)).astype(jnp.bfloat16)
    we_big = jnp.kron(eyeF, we_eff.astype(jnp.float32)).astype(jnp.bfloat16)
    ws_big = jnp.kron(eyeF, ws_eff.astype(jnp.float32)).astype(jnp.bfloat16)
    # Fused expand + shortcut weight: LHS = [b2 | x_EE].
    wf_big = jnp.concatenate([we_big, ws_big], axis=0)

    def fold_tap(w_tap, off):
        # entry [(j*D + cin), (wo*D + cout)] = w_tap[cin, cout] iff j == wo+off
        blk = jnp.zeros((F * D, F * D), jnp.float32)
        for wout in range(F):
            j = wout + off
            if 0 <= j < F:
                blk = blk.at[j * D:(j + 1) * D,
                             wout * D:(wout + 1) * D].set(w_tap)
        return blk

    # Kernel LHS layout: A = [EE | EO | OE | OO | shift_h(OE) | shift_h(OO)]
    # (row/col parity of the input pixel; kw=0 taps use column offset -1).
    b_ee = fold_tap(wt[1, 1], 0)
    b_eo = fold_tap(wt[1, 2], 0) + fold_tap(wt[1, 0], -1)
    b_oe = fold_tap(wt[2, 1], 0)
    b_oo = fold_tap(wt[2, 2], 0) + fold_tap(wt[2, 0], -1)
    b_soe = fold_tap(wt[0, 1], 0)
    b_soo = fold_tap(wt[0, 2], 0) + fold_tap(wt[0, 0], -1)
    wc_big = jnp.concatenate([b_ee, b_eo, b_oe, b_oo, b_soe, b_soo],
                             axis=0).astype(jnp.bfloat16)      # (6*Wo*D, Wo*D)

    t_red_f = jnp.tile(t_red, F).reshape(1, F * D)
    t_cv_f = jnp.tile(t_cv, F).reshape(1, F * D)
    t_out_f = jnp.tile(t_ex + t_sh, F).reshape(1, F * out_channels)

    params = dict(wr=wr_big, tr=t_red_f, wc=wc_big, tc=t_cv_f,
                  wf=wf_big, tf=t_out_f)

    # PyTorch-layout (OIHW) effective weights + shifts for the reference check.
    raw = dict(
        w_reduce_pt=wr_eff.astype(jnp.float32).T.reshape(D, in_channels, 1, 1),
        w_conv_pt=jnp.transpose(wg_eff.astype(jnp.float32),
                                (2, 4, 3, 0, 1)).reshape(D, Cg, 3, 3),
        w_expand_pt=we_eff.astype(jnp.float32).T.reshape(out_channels, D, 1, 1),
        w_short_pt=ws_eff.astype(jnp.float32).T.reshape(out_channels,
                                                        in_channels, 1, 1),
        t_red=t_red, t_cv=t_cv, t_ex=t_ex, t_sh=t_sh,
    )
    return params, raw


# ----------------------------------------------------------------------------
# Pure-JAX reference (validation only)
# ----------------------------------------------------------------------------
def reference_forward(x, raw, *, stride, cardinality):
    def conv(x, w, s, groups, pad):
        return lax.conv_general_dilated(
            x, w, window_strides=(s, s), padding=[(pad, pad), (pad, pad)],
            dimension_numbers=("NCHW", "OIHW", "NCHW"),
            feature_group_count=groups, precision=lax.Precision.HIGHEST)

    def shift(x, t):
        return x + t.reshape(1, -1, 1, 1)

    b = jax.nn.relu(shift(conv(x, raw["w_reduce_pt"], 1, 1, 0), raw["t_red"]))
    b = jax.nn.relu(shift(conv(b, raw["w_conv_pt"], stride, cardinality, 1),
                          raw["t_cv"]))
    b = shift(conv(b, raw["w_expand_pt"], 1, 1, 0), raw["t_ex"])
    r = shift(conv(x, raw["w_short_pt"], stride, 1, 0), raw["t_sh"])
    return jax.nn.relu(r + b)


# ----------------------------------------------------------------------------
if __name__ == "__main__":
    in_channels, out_channels = 16, 32
    stride, cardinality, widen_factor = 2, 4, 4
    N, H, W = 4, 16, 16            # -> images_per_step=2, grid=(2,), M=16

    key = jax.random.PRNGKey(0)
    kx, kp = jax.random.split(key)
    x = jax.random.normal(kx, (N, in_channels, H, W), jnp.float32)  # NCHW

    params, raw = make_params(kp, in_channels, out_channels, stride,
                              cardinality, widen_factor, H, W)

    fwd = jax.jit(functools.partial(resnext_bottleneck_forward, stride=stride))
    out = jax.block_until_ready(fwd(x, params))

    ref = jax.block_until_ready(
        reference_forward(x, raw, stride=stride, cardinality=cardinality))

    assert out.shape == (N, out_channels, H // stride, W // stride), out.shape
    err = float(jnp.max(jnp.abs(out - ref)))
    assert jnp.allclose(out, ref, rtol=1e-2, atol=1e-2), err

    print("KERNEL_OK")
</pallas_src>

<mosaic_0001>
module attributes {stable_mosaic.version = 11 : i64} {
  func.func @_fused_bottleneck_kernel(%arg0: i32, %arg1: memref<1x64x128xbf16, #tpu.memory_space<vmem>>, %arg2: memref<128x256xbf16, #tpu.memory_space<vmem>>, %arg3: memref<1x256xf32, #tpu.memory_space<vmem>>, %arg4: memref<1536x256xbf16, #tpu.memory_space<vmem>>, %arg5: memref<1x256xf32, #tpu.memory_space<vmem>>, %arg6: memref<384x256xbf16, #tpu.memory_space<vmem>>, %arg7: memref<1x256xf32, #tpu.memory_space<vmem>>, %arg8: memref<16x256xf32, #tpu.memory_space<vmem>>) attributes {dimension_semantics = [#tpu.dimension_semantics<parallel>], iteration_bounds = array<i64: 2>, scalar_prefetch = 0 : i64, scratch_operands = 0 : i64, tpu.core_type = #tpu.core_type<tc>, window_params = [{transform_indices = @transform_0, window_bounds = array<i64: 1, 64, 128>}, {pipeline_mode = #tpu.pipeline_mode<synchronous>, transform_indices = @transform_1, window_bounds = array<i64: 128, 256>}, {pipeline_mode = #tpu.pipeline_mode<synchronous>, transform_indices = @transform_2, window_bounds = array<i64: 1, 256>}, {pipeline_mode = #tpu.pipeline_mode<synchronous>, transform_indices = @transform_3, window_bounds = array<i64: 1536, 256>}, {pipeline_mode = #tpu.pipeline_mode<synchronous>, transform_indices = @transform_4, window_bounds = array<i64: 1, 256>}, {pipeline_mode = #tpu.pipeline_mode<synchronous>, transform_indices = @transform_5, window_bounds = array<i64: 384, 256>}, {pipeline_mode = #tpu.pipeline_mode<synchronous>, transform_indices = @transform_6, window_bounds = array<i64: 1, 256>}, {transform_indices = @transform_7, window_bounds = array<i64: 16, 256>}]} {
    %c0 = arith.constant 0 : index
    %c0_0 = arith.constant 0 : index
    %c0_1 = arith.constant 0 : index
    %0 = vector.load %arg1[%c0, %c0_0, %c0_1] : memref<1x64x128xbf16, #tpu.memory_space<vmem>>, vector<1x64x128xbf16>
    %1 = vector.shape_cast %0 : vector<1x64x128xbf16> to vector<64x128xbf16>
    %c0_2 = arith.constant 0 : index
    %c0_3 = arith.constant 0 : index
    %2 = vector.load %arg2[%c0_2, %c0_3] : memref<128x256xbf16, #tpu.memory_space<vmem>>, vector<128x256xbf16>
    %cst = arith.constant dense<0.000000e+00> : vector<64x256xf32>
    %3 = tpu.matmul %1, %2, %cst {dimension_numbers = #tpu.dot_dimension_numbers<[1], [0], [0], [1], [0, 0, 1, 1], [], []>} : vector<64x128xbf16>, vector<128x256xbf16>, vector<64x256xf32> -> vector<64x256xf32>
    %c0_4 = arith.constant 0 : index
    %c0_5 = arith.constant 0 : index
    %4 = vector.load %arg3[%c0_4, %c0_5] : memref<1x256xf32, #tpu.memory_space<vmem>>, vector<1x256xf32>
    %5 = vector.broadcast %4 : vector<1x256xf32> to vector<64x256xf32>
    %6 = arith.addf %3, %5 : vector<64x256xf32>
    %cst_6 = arith.constant 0.000000e+00 : f32
    %7 = vector.broadcast %cst_6 : f32 to vector<64x256xf32>
    %8 = arith.maximumf %6, %7 : vector<64x256xf32>
    %9 = vector.extract_strided_slice %8 {offsets = [0, 0], sizes = [16, 256], strides = [1, 1]} : vector<64x256xf32> to vector<16x256xf32>
    %10 = vector.extract_strided_slice %8 {offsets = [16, 0], sizes = [16, 256], strides = [1, 1]} : vector<64x256xf32> to vector<16x256xf32>
    %11 = vector.extract_strided_slice %8 {offsets = [32, 0], sizes = [16, 256], strides = [1, 1]} : vector<64x256xf32> to vector<16x256xf32>
    %12 = vector.extract_strided_slice %8 {offsets = [48, 0], sizes = [16, 256], strides = [1, 1]} : vector<64x256xf32> to vector<16x256xf32>
    %13 = tpu.iota {dimensions = array<i32: 0>} : vector<16x256xi32>
    %c8_i32 = arith.constant 8 : i32
    %c0_i32 = arith.constant 0 : i32
    %14 = arith.cmpi eq, %c8_i32, %c0_i32 : i32
    %c1_i32 = arith.constant 1 : i32
    %15 = arith.select %14, %c1_i32, %c8_i32 : i32
    %16 = vector.broadcast %15 : i32 to vector<16x256xi32>
    %17 = arith.remsi %13, %16 : vector<16x256xi32>
    %c0_i32_7 = arith.constant 0 : i32
    %18 = vector.broadcast %c0_i32_7 : i32 to vector<16x256xi32>
    %19 = arith.cmpi ne, %17, %18 : vector<16x256xi32>
    %c0_i32_8 = arith.constant 0 : i32
    %20 = vector.broadcast %c0_i32_8 : i32 to vector<16x256xi32>
    %21 = arith.cmpi slt, %17, %20 : vector<16x256xi32>
    %c0_i32_9 = arith.constant 0 : i32
    %22 = arith.cmpi slt, %15, %c0_i32_9 : i32
    %23 = vector.broadcast %22 : i1 to vector<16x256xi1>
    %24 = vector.broadcast %23 : vector<16x256xi1> to vector<16x256xi1>
    %25 = arith.xori %21, %24 : vector<16x256xi1>
    %26 = arith.andi %25, %19 : vector<16x256xi1>
    %27 = vector.broadcast %15 : i32 to vector<16x256xi32>
    %28 = arith.addi %17, %27 : vector<16x256xi32>
    %29 = arith.select %26, %28, %17 : vector<16x256xi1>, vector<16x256xi32>
    %c0_i32_10 = arith.constant 0 : i32
    %30 = vector.broadcast %c0_i32_10 : i32 to vector<16x256xi32>
    %31 = arith.cmpi eq, %29, %30 : vector<16x256xi32>
    %c1_i32_11 = arith.constant 1 : i32
    %32 = tpu.dynamic_rotate %11 by %c1_i32_11 dim 0 : vector<16x256xf32>, i32 -> vector<16x256xf32>
    %cst_12 = arith.constant 0.000000e+00 : f32
    %33 = vector.broadcast %cst_12 : f32 to vector<16x256xf32>
    %34 = arith.select %31, %33, %32 : vector<16x256xi1>, vector<16x256xf32>
    %c1_i32_13 = arith.constant 1 : i32
    %35 = tpu.dynamic_rotate %12 by %c1_i32_13 dim 0 : vector<16x256xf32>, i32 -> vector<16x256xf32>
    %cst_14 = arith.constant 0.000000e+00 : f32
    %36 = vector.broadcast %cst_14 : f32 to vector<16x256xf32>
    %37 = arith.select %31, %36, %35 : vector<16x256xi1>, vector<16x256xf32>
    %38 = arith.truncf %9 : vector<16x256xf32> to vector<16x256xbf16>
    %39 = arith.truncf %10 : vector<16x256xf32> to vector<16x256xbf16>
    %40 = arith.truncf %11 : vector<16x256xf32> to vector<16x256xbf16>
    %41 = arith.truncf %12 : vector<16x256xf32> to vector<16x256xbf16>
    %42 = arith.truncf %34 : vector<16x256xf32> to vector<16x256xbf16>
    %43 = arith.truncf %37 : vector<16x256xf32> to vector<16x256xbf16>
    %44 = tpu.concatenate %38, %39, %40, %41, %42, %43 in 1 : vector<16x256xbf16>, vector<16x256xbf16>, vector<16x256xbf16>, vector<16x256xbf16>, vector<16x256xbf16>, vector<16x256xbf16> -> vector<16x1536xbf16>
    %c0_15 = arith.constant 0 : index
    %c0_16 = arith.constant 0 : index
    %45 = vector.load %arg4[%c0_15, %c0_16] : memref<1536x256xbf16, #tpu.memory_space<vmem>>, vector<1536x256xbf16>
    %cst_17 = arith.constant dense<0.000000e+00> : vector<16x256xf32>
    %46 = tpu.matmul %44, %45, %cst_17 {dimension_numbers = #tpu.dot_dimension_numbers<[1], [0], [0], [1], [0, 0, 1, 1], [], []>} : vector<16x1536xbf16>, vector<1536x256xbf16>, vector<16x256xf32> -> vector<16x256xf32>
    %c0_18 = arith.constant 0 : index
    %c0_19 = arith.constant 0 : index
    %47 = vector.load %arg5[%c0_18, %c0_19] : memref<1x256xf32, #tpu.memory_space<vmem>>, vector<1x256xf32>
    %48 = vector.broadcast %47 : vector<1x256xf32> to vector<16x256xf32>
    %49 = arith.addf %46, %48 : vector<16x256xf32>
    %cst_20 = arith.constant 0.000000e+00 : f32
    %50 = vector.broadcast %cst_20 : f32 to vector<16x256xf32>
    %51 = arith.maximumf %49, %50 : vector<16x256xf32>
    %52 = arith.truncf %51 : vector<16x256xf32> to vector<16x256xbf16>
    %53 = vector.extract_strided_slice %1 {offsets = [0, 0], sizes = [16, 128], strides = [1, 1]} : vector<64x128xbf16> to vector<16x128xbf16>
    %54 = tpu.concatenate %52, %53 in 1 : vector<16x256xbf16>, vector<16x128xbf16> -> vector<16x384xbf16>
    %c0_21 = arith.constant 0 : index
    %c0_22 = arith.constant 0 : index
    %55 = vector.load %arg6[%c0_21, %c0_22] : memref<384x256xbf16, #tpu.memory_space<vmem>>, vector<384x256xbf16>
    %cst_23 = arith.constant dense<0.000000e+00> : vector<16x256xf32>
    %56 = tpu.matmul %54, %55, %cst_23 {dimension_numbers = #tpu.dot_dimension_numbers<[1], [0], [0], [1], [0, 0, 1, 1], [], []>} : vector<16x384xbf16>, vector<384x256xbf16>, vector<16x256xf32> -> vector<16x256xf32>
    %c0_24 = arith.constant 0 : index
    %c0_25 = arith.constant 0 : index
    %57 = vector.load %arg7[%c0_24, %c0_25] : memref<1x256xf32, #tpu.memory_space<vmem>>, vector<1x256xf32>
    %58 = vector.broadcast %57 : vector<1x256xf32> to vector<16x256xf32>
    %59 = arith.addf %56, %58 : vector<16x256xf32>
    %cst_26 = arith.constant 0.000000e+00 : f32
    %60 = vector.broadcast %cst_26 : f32 to vector<16x256xf32>
    %61 = arith.maximumf %59, %60 : vector<16x256xf32>
    %c0_27 = arith.constant 0 : index
    %c0_28 = arith.constant 0 : index
    %62 = vector.load %arg8[%c0_27, %c0_28] : memref<16x256xf32, #tpu.memory_space<vmem>>, vector<16x256xf32>
    tpu.vector_store %arg8[%c0_27, %c0_28], %61 {strides = array<i32>} : memref<16x256xf32, #tpu.memory_space<vmem>>, vector<16x256xf32>,
    return
  }
  func.func @transform_0(%arg0: i32) -> (i32, i32, i32) {
    %c0_i32 = arith.constant 0 : i32
    %c0_i32_0 = arith.constant 0 : i32
    %c0_i32_1 = arith.constant 0 : i32
    return %arg0, %c0_i32, %c0_i32_0 : i32, i32, i32
  }
  func.func @transform_1(%arg0: i32) -> (i32, i32) {
    %c0_i32 = arith.constant 0 : i32
    %c0_i32_0 = arith.constant 0 : i32
    %c0_i32_1 = arith.constant 0 : i32
    return %c0_i32, %c0_i32_0 : i32, i32
  }
  func.func @transform_2(%arg0: i32) -> (i32, i32) {
    %c0_i32 = arith.constant 0 : i32
    %c0_i32_0 = arith.constant 0 : i32
    %c0_i32_1 = arith.constant 0 : i32
    return %c0_i32, %c0_i32_0 : i32, i32
  }
  func.func @transform_3(%arg0: i32) -> (i32, i32) {
    %c0_i32 = arith.constant 0 : i32
    %c0_i32_0 = arith.constant 0 : i32
    %c0_i32_1 = arith.constant 0 : i32
    return %c0_i32, %c0_i32_0 : i32, i32
  }
  func.func @transform_4(%arg0: i32) -> (i32, i32) {
    %c0_i32 = arith.constant 0 : i32
    %c0_i32_0 = arith.constant 0 : i32
    %c0_i32_1 = arith.constant 0 : i32
    return %c0_i32, %c0_i32_0 : i32, i32
  }
  func.func @transform_5(%arg0: i32) -> (i32, i32) {
    %c0_i32 = arith.constant 0 : i32
    %c0_i32_0 = arith.constant 0 : i32
    %c0_i32_1 = arith.constant 0 : i32
    return %c0_i32, %c0_i32_0 : i32, i32
  }
  func.func @transform_6(%arg0: i32) -> (i32, i32) {
    %c0_i32 = arith.constant 0 : i32
    %c0_i32_0 = arith.constant 0 : i32
    %c0_i32_1 = arith.constant 0 : i32
    return %c0_i32, %c0_i32_0 : i32, i32
  }
  func.func @transform_7(%arg0: i32) -> (i32, i32) {
    %c0_i32 = arith.constant 0 : i32
    %c0_i32_0 = arith.constant 0 : i32
    return %arg0, %c0_i32 : i32, i32
  }
}

</mosaic_0001>

<bundles_post_ra>
// kernel: resnext_bottleneck_forward.1
= control target key start
LH: loop header
LB: loop body
LE: loop exit
PB: predicated region body
PF: predicated region fallthrough
CT: control target
= control target key end

     0   :  { %s3201_s24 = smov 0   ;;  %s4148_s0 = inlined_call_operand.vmem [shape: bf16[2,64,128], index: 0, kind: input, shape index: {}]   ;;  %s4149_s1 = inlined_call_operand.vmem [shape: bf16[128,256], index: 1, kind: input, shape index: {}]   ;;  %s4150_s2 = inlined_call_operand.vmem [shape: f32[1,256], index: 2, kind: input, shape index: {}]   ;;  %s4151_s3 = inlined_call_operand.vmem [shape: bf16[1536,256], index: 3, kind: input, shape index: {}]   ;;  %s4152_s4 = inlined_call_operand.vmem [shape: f32[1,256], index: 4, kind: input, shape index: {}]   ;;  %s4153_s5 = inlined_call_operand.vmem [shape: bf16[384,256], index: 5, kind: input, shape index: {}]   ;;  %s4154_s6 = inlined_call_operand.vmem [shape: f32[1,256], index: 6, kind: input, shape index: {}]   ;;  %s4155_s7 = inlined_call_operand.vmem [shape: f32[32,256], index: 7, kind: output, shape index: {}]  }
   0x1 LB: > { %s3207_s25 = sadd.s32 4294967295, %s3158_s24   ;;  %p2462_p0 = scmp.ge.s32.totalorder %s3158_s24, 1  ;;  %s3158_s24 = sphi %s3201_s24, %s17_s24  }
   0x2   : > { %p237_p1 = scmp.lt.s32.totalorder %s3158_s24, 3 }
   0x4   : > { %p238_p2 = pnand %p2462_p0, %p237_p1 }
   0x5   : > { %p270_p3 = scmp.lt.s32.totalorder (!%p238_p2), %s3207_s25, 1 }
   0x6   : > { %241 = sbr.rel (%p238_p2) target bundleno = 798 (0x31e), region = 48 }
   0xb   : > { %v2763_v0 = vld [vmem:[%s4149_s1 + $0x74] ss:$8 sps:$4 sm:$0xff]   ;;  %v2765_v1 = vld [vmem:[%s4149_s1 + $0x70] ss:$8 sps:$4 sm:$0xff]   ;;  %v3160_v2 = vmov 0   ;;  %s271_s9 = scalar_select %p270_p3, %s3207_s25, 1 }
   0xc   : > { %455 = vmatprep.mubr.bf16.mxu0 %v3160_v2  ;;  %423 = vmatprep.subr.bf16.mxu0 %v2763_v0  ;;  %v2766_v3 = vld [vmem:[%s4149_s1 + $0x64] ss:$8 sps:$4 sm:$0xff]   ;;  %v2768_v4 = vld [vmem:[%s4149_s1 + $0x60] ss:$8 sps:$4 sm:$0xff]   ;;  %v2769_v5 = vld [vmem:[%s4149_s1 + $0x54] ss:$8 sps:$4 sm:$0xff]  }
   0xd   : > { %424 = vmatpush1.bf16.msra.mxu0 %v2765_v1  ;;  %s2750_s14 = sshll.u32 %s271_s9, 5  ;;  %v2771_v6 = vld [vmem:[%s4149_s1 + $0x50] ss:$8 sps:$4 sm:$0xff]   ;;  %v2772_v7 = vld [vmem:[%s4149_s1 + $0x44] ss:$8 sps:$4 sm:$0xff]  }
   0xe   : > { %425 = vmatprep.subr.bf16.mxu0 %v2766_v3  ;;  %s3238_s21 = scalar_lea.vmem %s4148_s0, %s2750_s14  ;;  %v2774_v8 = vld [vmem:[%s4149_s1 + $0x40] ss:$8 sps:$4 sm:$0xff]   ;;  %v2775_v9 = vld [vmem:[%s4149_s1 + $0x34] ss:$8 sps:$4 sm:$0xff]   ;;  %v2777_v10 = vld [vmem:[%s4149_s1 + $0x30] ss:$8 sps:$4 sm:$0xff]  }
   0xf   : > { %v2778_v11 = vld [vmem:[%s4149_s1 + $0x24] ss:$8 sps:$4 sm:$0xff]   ;;  %v2791_v12 = vld [vmem:[%s4151_s3 + $0x74] ss:$8 sps:$4 sm:$0xff]   ;;  %v2793_v13 = vld [vmem:[%s4151_s3 + $0x70] ss:$8 sps:$4 sm:$0xff]  }
  0x10   : > { %v2794_v14 = vld [vmem:[%s4151_s3 + $0x64] ss:$8 sps:$4 sm:$0xff]   ;;  %1742 = vmatprep.subr.bf16.mxu1 %v2791_v12  ;;  %v2796_v15 = vld [vmem:[%s4151_s3 + $0x60] ss:$8 sps:$4 sm:$0xff]   ;;  %v2797_v17 = vld [vmem:[%s4151_s3 + $0x54] ss:$8 sps:$4 sm:$0xff]  }
  0x11   : > { %426 = vmatpush1.bf16.msra.mxu0 %v2768_v4  ;;  %1743 = vmatpush1.bf16.msra.mxu1 %v2793_v13  ;;  %v2780_v16 = vld [vmem:[%s4149_s1 + $0x20] ss:$8 sps:$4 sm:$0xff]   ;;  %v2781_v18 = vld [vmem:[%s4149_s1 + $0x14] ss:$8 sps:$4 sm:$0xff]   ;;  %v2783_v19 = vld [vmem:[%s4149_s1 + $0x10] ss:$8 sps:$4 sm:$0xff]  }
  0x12   : > { %427 = vmatprep.subr.bf16.mxu0 %v2769_v5  ;;  %1744 = vmatprep.subr.bf16.mxu1 %v2794_v14  ;;  %v2802_v20 = vld [vmem:[%s4151_s3 + $0x50] ss:$8 sps:$4 sm:$0xff]   ;;  %v2803_v21 = vld [vmem:[%s4151_s3 + $0x44] ss:$8 sps:$4 sm:$0xff]   ;;  %v2808_v23 = vld [vmem:[%s4151_s3 + $0x40] ss:$8 sps:$4 sm:$0xff]  }
  0x13   : > { %v2784_v22 = vld [vmem:[%s4149_s1 + $0x4] ss:$8 sps:$4 sm:$0xff]   ;;  %v2786_v24 = vld [vmem:[%s4149_s1] ss:$8 sps:$4 sm:$0xff]   ;;  %v2809_v25 = vld [vmem:[%s4151_s3 + $0x34] ss:$8 sps:$4 sm:$0xff]  }
  0x14   : > { %v2801_v26 = vld [vmem:[%s4151_s3 + $0x174] ss:$8 sps:$4 sm:$0xff]   ;;  %v2787_v27 = vld [vmem:[%s3238_s21] sm:$0xff]   ;;  %v2814_v28 = vld [vmem:[%s4151_s3 + $0x30] ss:$8 sps:$4 sm:$0xff]  }
  0x15   : > { %428 = vmatpush1.bf16.msra.mxu0 %v2771_v6  ;;  %1745 = vmatpush1.bf16.msra.mxu1 %v2796_v15  ;;  %v2799_v29 = vld [vmem:[%s4151_s3 + $0x170] ss:$8 sps:$4 sm:$0xff]   ;;  %v2807_v30 = vld [vmem:[%s4151_s3 + $0x164] ss:$8 sps:$4 sm:$0xff]   ;;  %v2820_v32 = vld [vmem:[%s4151_s3 + $0x20] ss:$8 sps:$4 sm:$0xff]  }
  0x16   : > { %429 = vmatprep.subr.bf16.mxu0 %v2772_v7  ;;  %1746 = vmatprep.subr.bf16.mxu1 %v2797_v17  ;;  %v2815_v31 = vld [vmem:[%s4151_s3 + $0x24] ss:$8 sps:$4 sm:$0xff]   ;;  %v2805_v33 = vld [vmem:[%s4151_s3 + $0x160] ss:$8 sps:$4 sm:$0xff]   ;;  %v2821_v34 = vld [vmem:[%s4151_s3 + $0x14] ss:$8 sps:$4 sm:$0xff]  }
  0x17   : > { %v2813_v35 = vld [vmem:[%s4151_s3 + $0x154] ss:$8 sps:$4 sm:$0xff]   ;;  %v2788_v36 = vld [vmem:[%s3238_s21 + $0x8] sm:$0xff]   ;;  %v2826_v37 = vld [vmem:[%s4151_s3 + $0x10] ss:$8 sps:$4 sm:$0xff]  }
  0x18   : > { %v2811_v38 = vld [vmem:[%s4151_s3 + $0x150] ss:$8 sps:$4 sm:$0xff]   ;;  %v2819_v39 = vld [vmem:[%s4151_s3 + $0x144] ss:$8 sps:$4 sm:$0xff]   ;;  %v2832_v41 = vld [vmem:[%s4151_s3] ss:$8 sps:$4 sm:$0xff]  }
  0x19   : > { %430 = vmatpush1.bf16.msra.mxu0 %v2774_v8  ;;  %1747 = vmatpush1.bf16.msra.mxu1 %v2802_v20  ;;  %v2827_v40 = vld [vmem:[%s4151_s3 + $0x4] ss:$8 sps:$4 sm:$0xff]   ;;  %v2817_v42 = vld [vmem:[%s4151_s3 + $0x140] ss:$8 sps:$4 sm:$0xff]   ;;  %v2833_v43 = vld [vmem:[%s4151_s3 + $0xf4] ss:$8 sps:$4 sm:$0xff]  }
  0x1a   : > { %431 = vmatprep.subr.bf16.mxu0 %v2775_v9  ;;  %1748 = vmatprep.subr.bf16.mxu1 %v2803_v21  ;;  %v2789_v44 = vld [vmem:[%s3238_s21 + $0x10] sm:$0xff]   ;;  %v2831_v47 = vld [vmem:[%s4151_s3 + $0x124] ss:$8 sps:$4 sm:$0xff]   ;;  %v2844_v50 = vld [vmem:[%s4151_s3 + $0xe0] ss:$8 sps:$4 sm:$0xff]  }
  0x1b   : > { %v2825_v45 = vld [vmem:[%s4151_s3 + $0x134] ss:$8 sps:$4 sm:$0xff]   ;;  %v2823_v46 = vld [vmem:[%s4151_s3 + $0x130] ss:$8 sps:$4 sm:$0xff]   ;;  %v2839_v49 = vld [vmem:[%s4151_s3 + $0xe4] ss:$8 sps:$4 sm:$0xff]  }
  0x1c   : > { %v2838_v48 = vld [vmem:[%s4151_s3 + $0xf0] ss:$8 sps:$4 sm:$0xff]   ;;  %v2829_v51 = vld [vmem:[%s4151_s3 + $0x120] ss:$8 sps:$4 sm:$0xff]   ;;  %v2845_v52 = vld [vmem:[%s4151_s3 + $0xd4] ss:$8 sps:$4 sm:$0xff]  }
  0x1d   : > { %432 = vmatpush1.bf16.msra.mxu0 %v2777_v10  ;;  %1749 = vmatpush1.bf16.msra.mxu1 %v2808_v23  ;;  %v2837_v53 = vld [vmem:[%s4151_s3 + $0x114] ss:$8 sps:$4 sm:$0xff]   ;;  %v2850_v55 = vld [vmem:[%s4151_s3 + $0xd0] ss:$8 sps:$4 sm:$0xff]   ;;  %v2851_v57 = vld [vmem:[%s4151_s3 + $0xc4] ss:$8 sps:$4 sm:$0xff]  }
  0x1e   : > { %433 = vmatprep.subr.bf16.mxu0 %v2778_v11  ;;  %1750 = vmatprep.subr.bf16.mxu1 %v2809_v25  ;;  %v2790_v54 = vld [vmem:[%s3238_s21 + $0x18] sm:$0xff]   ;;  %v2843_v58 = vld [vmem:[%s4151_s3 + $0x104] ss:$8 sps:$4 sm:$0xff]   ;;  %v2856_v59 = vld [vmem:[%s4151_s3 + $0xc0] ss:$8 sps:$4 sm:$0xff]  }
  0x1f   : > { %v2835_v56 = vld [vmem:[%s4151_s3 + $0x110] ss:$8 sps:$4 sm:$0xff]   ;;  %v2841_v60 = vld [vmem:[%s4151_s3 + $0x100] ss:$8 sps:$4 sm:$0xff]   ;;  %v2857_v61 = vld [vmem:[%s4151_s3 + $0xb4] ss:$8 sps:$4 sm:$0xff]  }
  0x20   : > { %v2849_v62 = vld [vmem:[%s4151_s3 + $0x1f4] ss:$8 sps:$4 sm:$0xff]   ;;  %v2862_v63 = vld [vmem:[%s4151_s3 + $0xb0] ss:$8 sps:$4 sm:$0xff]   ;;  %v2855_v1 = vld [vmem:[%s4151_s3 + $0x1e4] ss:$8 sps:$4 sm:$0xff]  }
  0x21   : > { %434 = vmatpush1.bf16.msra.mxu0 %v2780_v16  ;;  %1751 = vmatpush1.bf16.msra.mxu1 %v2814_v28  ;;  %v2847_v0 = vld [vmem:[%s4151_s3 + $0x1f0] ss:$8 sps:$4 sm:$0xff]   ;;  %v2853_v3 = vld [vmem:[%s4151_s3 + $0x1e0] ss:$8 sps:$4 sm:$0xff]   ;;  %v2861_v4 = vld [vmem:[%s4151_s3 + $0x1d4] ss:$8 sps:$4 sm:$0xff]  }
  0x22   : > { %435 = vmatprep.subr.bf16.mxu0 %v2781_v18  ;;  %1752 = vmatprep.subr.bf16.mxu1 %v2815_v31  ;;  %v2859_v5 = vld [vmem:[%s4151_s3 + $0x1d0] ss:$8 sps:$4 sm:$0xff]   ;;  %v2863_v6 = vld [vmem:[%s4151_s3 + $0xa4] ss:$8 sps:$4 sm:$0xff]   ;;  %v2865_v8 = vld [vmem:[%s4151_s3 + $0x1c0] ss:$8 sps:$4 sm:$0xff]  }
  0x23   : > { %v2867_v7 = vld [vmem:[%s4151_s3 + $0x1c4] ss:$8 sps:$4 sm:$0xff]   ;;  %v2868_v9 = vld [vmem:[%s4151_s3 + $0xa0] ss:$8 sps:$4 sm:$0xff]   ;;  %v2869_v10 = vld [vmem:[%s4151_s3 + $0x94] ss:$8 sps:$4 sm:$0xff]  }
  0x24   : > { %v2873_v11 = vld [vmem:[%s4151_s3 + $0x1b4] ss:$8 sps:$4 sm:$0xff]   ;;  %v2871_v12 = vld [vmem:[%s4151_s3 + $0x1b0] ss:$8 sps:$4 sm:$0xff]   ;;  %v2875_v14 = vld [vmem:[%s4151_s3 + $0x84] ss:$8 sps:$4 sm:$0xff]  }
  0x25   : > { %436 = vmatpush1.bf16.msra.mxu0 %v2783_v19  ;;  %1753 = vmatpush1.bf16.msra.mxu1 %v2820_v32  ;;  %v2874_v13 = vld [vmem:[%s4151_s3 + $0x90] ss:$8 sps:$4 sm:$0xff]   ;;  %v2879_v15 = vld [vmem:[%s4151_s3 + $0x1a4] ss:$8 sps:$4 sm:$0xff]   ;;  %v2877_v16 = vld [vmem:[%s4151_s3 + $0x1a0] ss:$8 sps:$4 sm:$0xff]  }
  0x26   : > { %437 = vmatprep.subr.bf16.mxu0 %v2784_v22  ;;  %1754 = vmatprep.subr.bf16.mxu1 %v2821_v34  ;;  %v2880_v17 = vld [vmem:[%s4151_s3 + $0x80] ss:$8 sps:$4 sm:$0xff]   ;;  %v2883_v18 = vld [vmem:[%s4151_s3 + $0x194] ss:$8 sps:$4 sm:$0xff]   ;;  %v2881_v20 = vld [vmem:[%s4151_s3 + $0x190] ss:$8 sps:$4 sm:$0xff]  }
  0x27   : > { %v2886_v19 = vld [vmem:[%s4151_s3 + $0x274] ss:$8 sps:$4 sm:$0xff]   ;;  %v2889_v21 = vld [vmem:[%s4151_s3 + $0x184] ss:$8 sps:$4 sm:$0xff]   ;;  %v2887_v22 = vld [vmem:[%s4151_s3 + $0x180] ss:$8 sps:$4 sm:$0xff]  }
  0x28   : > { %v2898_v23 = vld [vmem:[%s4151_s3 + $0x374] ss:$8 sps:$4 sm:$0xff]   ;;  %v307_v28 = vld [vmem:[%s4150_s2] sm:$0x3] }
  0x29   : > { %438 = vmatpush1.bf16.msra.mxu0 %v2786_v24  ;;  %1755 = vmatpush1.bf16.msra.mxu1 %v2826_v37  ;;  %v309_v24 = vlaneseq }
  0x2a   : > { %1785 = vmatprep.subr.bf16.mxu0 %v2801_v26  ;;  %1756 = vmatprep.subr.bf16.mxu1 %v2827_v40 }
  0x2b   : > { %v3472_v25 = vshrl.u32 %v309_v24, 7 }
  0x2c   : > { %456 = vmatmul.mubr.bf16.vlgmr.msra.gmra.mxu0 %v2787_v27 }
  0x2d   : > { %465 = vmatprep.mubr.bf16.mxu0 %v3160_v2  ;;  %1786 = vmatpush1.bf16.msra.mxu0 %v2799_v29  ;;  %v3475_v26 = vsub.s32 1, %v3472_v25  ;;  %v3478_v27 = vsub.s32 0, %v3472_v25  ;;  %vm545_vm0 = vcmp.lt.s32.totalorder %v3472_v25, 1 }
  0x2e   : > { %1787 = vmatprep.subr.bf16.mxu0 %v2807_v30  ;;  %1757 = vmatpush1.bf16.msra.mxu1 %v2832_v41 }
  0x2f   : > { %1758 = vmatprep.subr.bf16.mxu1 %v2833_v43  ;;  %v3484_v30 = vrot.slane %v307_v28, %v3475_v26  ;;  %v3487_v31 = vrot.slane %v307_v28, %v3478_v27 }
  0x31   : > { %1788 = vmatpush1.bf16.msra.mxu0 %v2805_v33 }
  0x32   : > { %1789 = vmatprep.subr.bf16.mxu0 %v2813_v35  ;;  %1759 = vmatpush2.bf16.msra.mxu1 %v2838_v48 }
  0x33   : > { %1760 = vmatprep.subr.bf16.mxu1 %v2839_v49  ;;  %v2892_v49 = vld [vmem:[%s4151_s3 + $0x264] ss:$8 sps:$4 sm:$0xff]  }
  0x34   : > { %466 = vmatmul.mubr.bf16.gmra.mxu0 %v2788_v36 }
  0x35   : > { %475 = vmatprep.mubr.bf16.mxu0 %v3160_v2  ;;  %1790 = vmatpush1.bf16.msra.mxu0 %v2811_v38 }
  0x36   : > { %1791 = vmatprep.subr.bf16.mxu0 %v2819_v39  ;;  %1761 = vmatpush2.bf16.msra.mxu1 %v2844_v50 }
  0x37   : > { %1762 = vmatprep.subr.bf16.mxu1 %v2845_v52 }
  0x39   : > { %1792 = vmatpush1.bf16.msra.mxu0 %v2817_v42 }
  0x3a   : > { %1793 = vmatprep.subr.bf16.mxu0 %v2825_v45  ;;  %1763 = vmatpush2.bf16.msra.mxu1 %v2850_v55  ;;  %v2890_v55 = vld [vmem:[%s4151_s3 + $0x260] ss:$8 sps:$4 sm:$0xff]  }
  0x3b   : > { %1764 = vmatprep.subr.bf16.mxu1 %v2851_v57  ;;  %v2895_v57 = vld [vmem:[%s4151_s3 + $0x254] ss:$8 sps:$4 sm:$0xff]  }
  0x3c   : > { %476 = vmatmul.mubr.bf16.gmra.mxu0 %v2789_v44 }
  0x3d   : > { %485 = vmatprep.mubr.bf16.mxu0 %v3160_v2  ;;  %1794 = vmatpush1.bf16.msra.mxu0 %v2823_v46  ;;  %v2884_v46 = vld [vmem:[%s4151_s3 + $0x270] ss:$8 sps:$4 sm:$0xff]  }
  0x3e   : > { %1795 = vmatprep.subr.bf16.mxu0 %v2831_v47  ;;  %1765 = vmatpush2.bf16.msra.mxu1 %v2856_v59 }
  0x3f   : > { %1766 = vmatprep.subr.bf16.mxu1 %v2857_v61 }
  0x41   : > { %1796 = vmatpush1.bf16.msra.mxu0 %v2829_v51 }
  0x42   : > { %1797 = vmatprep.subr.bf16.mxu0 %v2837_v53  ;;  %1767 = vmatpush2.bf16.msra.mxu1 %v2862_v63 }
  0x43   : > { %1768 = vmatprep.subr.bf16.mxu1 %v2863_v6  ;;  %v2904_v6 = vld [vmem:[%s4151_s3 + $0x364] ss:$8 sps:$4 sm:$0xff]  }
  0x44   : > { %486 = vmatmul.mubr.bf16.gmra.mxu0 %v2790_v54 }
  0x45   : > { %1798 = vmatpush1.bf16.msra.mxu0 %v2835_v56 }
  0x46   : > { %1799 = vmatprep.subr.bf16.mxu0 %v2843_v58  ;;  %1769 = vmatpush2.bf16.msra.mxu1 %v2868_v9  ;;  %v2899_v9 = vld [vmem:[%s4151_s3 + $0x240] ss:$8 sps:$4 sm:$0xff]  }
  0x47   : > { %1770 = vmatprep.subr.bf16.mxu1 %v2869_v10  ;;  %v2902_v10 = vld [vmem:[%s4151_s3 + $0x360] ss:$8 sps:$4 sm:$0xff]  }
  0x49   : > { %1800 = vmatpush1.bf16.msra.mxu0 %v2841_v60 }
  0x4a   : > { %1801 = vmatprep.subr.bf16.mxu0 %v2849_v62  ;;  %1771 = vmatpush2.bf16.msra.mxu1 %v2874_v13  ;;  %v2907_v13 = vld [vmem:[%s4151_s3 + $0x234] ss:$8 sps:$4 sm:$0xff]  }
  0x4b   : > { %1772 = vmatprep.subr.bf16.mxu1 %v2875_v14  ;;  %v2910_v14 = vld [vmem:[%s4151_s3 + $0x354] ss:$8 sps:$4 sm:$0xff]  }
  0x4d   : > { %1802 = vmatpush2.bf16.msra.mxu0 %v2847_v0  ;;  %v2893_v0 = vld [vmem:[%s4151_s3 + $0x250] ss:$8 sps:$4 sm:$0xff]  }
  0x4e   : > { %1803 = vmatprep.subr.bf16.mxu0 %v2855_v1  ;;  %1773 = vmatpush2.bf16.msra.mxu1 %v2880_v17  ;;  %v2896_v1 = vld [vmem:[%s4151_s3 + $0x370] ss:$8 sps:$4 sm:$0xff]  }
  0x4f   : > { %1828 = vmatprep.subr.bf16.mxu1 %v2886_v19  ;;  %v2905_v19 = vld [vmem:[%s4151_s3 + $0x230] ss:$8 sps:$4 sm:$0xff]  }
  0x51   : > { %1804 = vmatpush2.bf16.msra.mxu0 %v2853_v3 }
  0x52   : > { %1805 = vmatprep.subr.bf16.mxu0 %v2861_v4 }
  0x55   : > { %1806 = vmatpush2.bf16.msra.mxu0 %v2859_v5  ;;  %v2901_v5 = vld [vmem:[%s4151_s3 + $0x244] ss:$8 sps:$4 sm:$0xff]  }
  0x56   : > { %1807 = vmatprep.subr.bf16.mxu0 %v2867_v7 }
  0x59   : > { %1808 = vmatpush2.bf16.msra.mxu0 %v2865_v8 }
  0x5a   : > { %1809 = vmatprep.subr.bf16.mxu0 %v2873_v11 }
  0x5d   : > { %1810 = vmatpush2.bf16.msra.mxu0 %v2871_v12 }
  0x5e   : > { %1811 = vmatprep.subr.bf16.mxu0 %v2879_v15 }
  0x61   : > { %1812 = vmatpush2.bf16.msra.mxu0 %v2877_v16 }
  0x62   : > { %1813 = vmatprep.subr.bf16.mxu0 %v2883_v18 }
  0x65   : > { %1814 = vmatpush2.bf16.msra.mxu0 %v2881_v20  ;;  %v2908_v20 = vld [vmem:[%s4151_s3 + $0x350] ss:$8 sps:$4 sm:$0xff]  }
  0x66   : > { %1815 = vmatprep.subr.bf16.mxu0 %v2889_v21 }
  0x69   : > { %1816 = vmatpush2.bf16.msra.mxu0 %v2887_v22  ;;  %v2913_v22 = vld [vmem:[%s4151_s3 + $0x224] ss:$8 sps:$4 sm:$0xff]  }
  0x6a   : > { %1871 = vmatprep.subr.bf16.mxu0 %v2898_v23  ;;  %v2916_v23 = vld [vmem:[%s4151_s3 + $0x344] ss:$8 sps:$4 sm:$0xff]  }
  0xec   : > { %v457_v29 = vpop.f32.mrf.mxu0 }
  0xed   : > { %v458_v36 = vadd.f32 %v457_v29, %v3487_v31 }
  0xee   : > { %v459_v32 = vpop.f32.mrf.mxu0 }
  0xef   : > { %v460_v34 = vadd.f32 %v459_v32, %v3484_v30  ;;  %v496_v43 = vmax.f32 %v458_v36, 0.0 }
  0xf0   : > { %v461_v33 = vpop.f32.mrf.mxu0 }
  0xf1   : > { %v462_v35 = vadd.f32 %v461_v33, %v3487_v31  ;;  %v497_v41 = vmax.f32 %v460_v34, 0.0  ;;  %v2911_v33 = vld [vmem:[%s4151_s3 + $0x220] ss:$8 sps:$4 sm:$0xff]  }
  0xf2   : > { %v463_v37 = vpop.f32.mrf.mxu0 }
  0xf3   : > { %v464_v38 = vadd.f32 %v463_v37, %v3484_v30  ;;  %v498_v39 = vmax.f32 %v462_v35, 0.0  ;;  %v2914_v35 = vld [vmem:[%s4151_s3 + $0x340] ss:$8 sps:$4 sm:$0xff]  }
  0xf4   : > { %v467_v40 = vpop.f32.mrf.mxu0 }
  0xf5   : > { %v499_v42 = vmax.f32 %v464_v38, 0.0  ;;  %v566_v47 = vpack.c.bf16 %v498_v39, %v496_v43  ;;  %v468_v52 = vadd.f32 %v467_v40, %v3487_v31  ;;  %v2919_v40 = vld [vmem:[%s4151_s3 + $0x214] ss:$8 sps:$4 sm:$0xff]  }
  0xf6   : > { %v469_v44 = vpop.f32.mrf.mxu0 }
  0xf7   : > { %v567_v45 = vpack.c.bf16 %v499_v42, %v497_v41  ;;  %v470_v50 = vadd.f32 %v469_v44, %v3484_v30  ;;  %v500_v61 = vmax.f32 %v468_v52, 0.0  ;;  %v2922_v41 = vld [vmem:[%s4151_s3 + $0x334] ss:$8 sps:$4 sm:$0xff]   ;;  %v2920_v44 = vld [vmem:[%s4151_s3 + $0x330] ss:$8 sps:$4 sm:$0xff]  }
  0xf8   : > { %v471_v48 = vpop.f32.mrf.mxu0  ;;  %v2926_v52 = vld [vmem:[%s4151_s3 + $0x320] ss:$8 sps:$4 sm:$0xff]  }
  0xf9   : > { %v472_v51 = vadd.f32 %v471_v48, %v3487_v31  ;;  %1774 = vmatprep.mubr.bf16.mxu1 %v567_v45  ;;  %v501_v59 = vmax.f32 %v470_v50, 0.0  ;;  %v2925_v48 = vld [vmem:[%s4151_s3 + $0x204] ss:$8 sps:$4 sm:$0xff]  }
  0xfa   : > { %v473_v53 = vpop.f32.mrf.mxu0  ;;  %1775 = vmatmul.mubr.bf16.vlgmr.msra.gmra.mxu1 %v566_v47 }
  0xfb   : > { %v474_v54 = vadd.f32 %v473_v53, %v3484_v30  ;;  %1829 = vmatpush1.bf16.msra.mxu1 %v2884_v46  ;;  %v502_v56 = vmax.f32 %v472_v51, 0.0  ;;  %v2923_v51 = vld [vmem:[%s4151_s3 + $0x200] ss:$8 sps:$4 sm:$0xff]   ;;  %v2931_v53 = vld [vmem:[%s4151_s3 + $0x2f4] ss:$8 sps:$4 sm:$0xff]  }
  0xfc   : > { %1830 = vmatprep.subr.bf16.mxu1 %v2892_v49  ;;  %v3509_v58 = vpop.f32.mrf.mxu0  ;;  %v2928_v49 = vld [vmem:[%s4151_s3 + $0x324] ss:$8 sps:$4 sm:$0xff]  }
  0xfd   : > { %v503_v60 = vmax.f32 %v474_v54, 0.0  ;;  %v568_v4 = vpack.c.bf16 %v502_v56, %v500_v61  ;;  %v2934_v54 = vld [vmem:[%s4151_s3 + $0x314] ss:$8 sps:$4 sm:$0xff]   ;;  %v2932_v56 = vld [vmem:[%s4151_s3 + $0x310] ss:$8 sps:$4 sm:$0xff]  }
  0xfe   : > { %v479_v62 = vpop.f32.mrf.mxu0  ;;  %v2938_v61 = vld [vmem:[%s4151_s3 + $0x300] ss:$8 sps:$4 sm:$0xff]  }
  0xff   : > { %v569_v63 = vpack.c.bf16 %v503_v60, %v501_v59  ;;  %1831 = vmatpush1.bf16.msra.mxu1 %v2890_v55  ;;  %v3518_v3 = vadd.f32 %v479_v62, %v3484_v30  ;;  %v2929_v55 = vld [vmem:[%s4151_s3 + $0x2f0] ss:$8 sps:$4 sm:$0xff]   ;;  %v2940_v59 = vld [vmem:[%s4151_s3 + $0x304] ss:$8 sps:$4 sm:$0xff]   ;;  %v2935_v60 = vld [vmem:[%s4151_s3 + $0x2e0] ss:$8 sps:$4 sm:$0xff]  }
 0x100   : > { %1832 = vmatprep.subr.bf16.mxu1 %v2895_v57  ;;  %v3526_v7 = vpop.f32.mrf.mxu0  ;;  %v2937_v57 = vld [vmem:[%s4151_s3 + $0x2e4] ss:$8 sps:$4 sm:$0xff]   ;;  %v2943_v62 = vld [vmem:[%s4151_s3 + $0x2d4] ss:$8 sps:$4 sm:$0xff]  }
 0x101   : > { %1817 = vmatprep.mubr.bf16.mxu0 %v569_v63  ;;  %v505_v11 = vmax.f32 %v3518_v3, 0.0  ;;  %v2946_v63 = vld [vmem:[%s4151_s3 + $0x3f4] ss:$8 sps:$4 sm:$0xff]  }
 0x102   : > { %1818 = vmatmul.mubr.bf16.vlgmr.msra.gmra.mxu0 %v568_v4  ;;  %v483_v8 = vpop.f32.mrf.mxu0  ;;  %v2949_v4 = vld [vmem:[%s4151_s3 + $0x2c4] ss:$8 sps:$4 sm:$0xff]   ;;  %v2979_v3 = vld [vmem:[%s4151_s3 + $0x394] ss:$8 sps:$4 sm:$0xff]  }
 0x103   : > { %1833 = vmatpush1.bf16.msra.mxu1 %v2893_v0  ;;  %1872 = vmatpush1.bf16.msra.mxu0 %v2896_v1  ;;  %v3536_v12 = vadd.f32 %v483_v8, %v3484_v30  ;;  %v2941_v0 = vld [vmem:[%s4151_s3 + $0x2d0] ss:$8 sps:$4 sm:$0xff]   ;;  %v2950_v8 = vld [vmem:[%s4151_s3 + $0x3e0] ss:$8 sps:$4 sm:$0xff]  }
 0x104   : > { %1834 = vmatprep.subr.bf16.mxu1 %v2901_v5  ;;  %1873 = vmatprep.subr.bf16.mxu0 %v2904_v6  ;;  %v487_v15 = vpop.f32.mrf.mxu0  ;;  %v2944_v1 = vld [vmem:[%s4151_s3 + $0x3f0] ss:$8 sps:$4 sm:$0xff]   ;;  %v2952_v5 = vld [vmem:[%s4151_s3 + $0x3e4] ss:$8 sps:$4 sm:$0xff]   ;;  %v2947_v6 = vld [vmem:[%s4151_s3 + $0x2c0] ss:$8 sps:$4 sm:$0xff]  }
 0x105   : > { %v507_v16 = vmax.f32 %v3536_v12, 0.0  ;;  %v3546_v17 = vadd.f32 %v487_v15, %v3487_v31  ;;  %v2961_v15 = vld [vmem:[%s4151_s3 + $0x2a4] ss:$8 sps:$4 sm:$0xff]  }
 0x106   : > { %v489_v18 = vpop.f32.mrf.mxu0 }
 0x107   : > { %1835 = vmatpush1.bf16.msra.mxu1 %v2899_v9  ;;  %1874 = vmatpush1.bf16.msra.mxu0 %v2902_v10  ;;  %v571_v21 = vpack.c.bf16 %v507_v16, %v505_v11  ;;  %v508_v24 = vmax.f32 %v3546_v17, 0.0  ;;  %v3566_v28 = vadd.f32 %v489_v18, %v3484_v30  ;;  %v2955_v9 = vld [vmem:[%s4151_s3 + $0x2b4] ss:$8 sps:$4 sm:$0xff]   ;;  %v2964_v18 = vld [vmem:[%s4151_s3 + $0x3c4] ss:$8 sps:$4 sm:$0xff]  }
 0x108   : > { %1836 = vmatprep.subr.bf16.mxu1 %v2907_v13  ;;  %1875 = vmatprep.subr.bf16.mxu0 %v2910_v14  ;;  %v491_v29 = vpop.f32.mrf.mxu0  ;;  %v2958_v10 = vld [vmem:[%s4151_s3 + $0x3d4] ss:$8 sps:$4 sm:$0xff]   ;;  %v2953_v13 = vld [vmem:[%s4151_s3 + $0x2b0] ss:$8 sps:$4 sm:$0xff]   ;;  %v2995_v17 = vld [vmem:[%s4151_s3 + $0x440] ss:$8 sps:$4 sm:$0xff]  }
 0x109   : > { %v3569_v32 = vadd.f32 %v491_v29, %v3487_v31  ;;  %1860 = vmatprep.mubr.bf16.mxu1 %v571_v21  ;;  %v554_v36 = vrot.slane %v508_v24, 7  ;;  %v509_v37 = vmax.f32 %v3566_v28, 0.0  ;;  %v2956_v14 = vld [vmem:[%s4151_s3 + $0x3d0] ss:$8 sps:$4 sm:$0xff]   ;;  %v2967_v21 = vld [vmem:[%s4151_s3 + $0x294] ss:$8 sps:$4 sm:$0xff]  }
 0x10a   : > { %v493_v34 = vpop.f32.mrf.mxu0  ;;  %v2965_v29 = vld [vmem:[%s4151_s3 + $0x290] ss:$8 sps:$4 sm:$0xff]   ;;  %v2991_v28 = vld [vmem:[%s4151_s3 + $0x454] ss:$8 sps:$4 sm:$0xff]  }
 0x10b   : > { %1837 = vmatpush1.bf16.msra.mxu1 %v2905_v19  ;;  %1876 = vmatpush1.bf16.msra.mxu0 %v2908_v20  ;;  %v510_v38 = vmax.f32 %v3569_v32, 0.0  ;;  %v3582_v39 = vadd.f32 %v493_v34, %v3484_v30  ;;  %v2917_v30 = vld [vmem:[%s4151_s3 + $0x210] ss:$8 sps:$4 sm:$0xff]   ;;  %v2959_v19 = vld [vmem:[%s4151_s3 + $0x2a0] ss:$8 sps:$4 sm:$0xff]   ;;  %v3713_v34 = vadd.f32 %v3509_v58, %v3487_v31  ;;  %v542_v58 = vrot.slane %v505_v11, 7 }
 0x10c   : > { %1838 = vmatprep.subr.bf16.mxu1 %v2913_v22  ;;  %1877 = vmatprep.subr.bf16.mxu0 %v2916_v23  ;;  %v2962_v20 = vld [vmem:[%s4151_s3 + $0x3c0] ss:$8 sps:$4 sm:$0xff]   ;;  %v2970_v22 = vld [vmem:[%s4151_s3 + $0x3b4] ss:$8 sps:$4 sm:$0xff]   ;;  %v514_v23 = vadd.s32 8, %v3472_v25 }
 0x10d   : > { %v556_v42 = vrot.slane %v510_v38, 7  ;;  %v511_v43 = vmax.f32 %v3582_v39, 0.0  ;;  %v2982_v11 = vld [vmem:[%s4151_s3 + $0x474] ss:$8 sps:$4 sm:$0xff]  }
 0x10e   : > { %v3003_v32 = vld [vmem:[%s4151_s3 + $0x434] ss:$8 sps:$4 sm:$0xff]  }
 0x10f   : > { %1839 = vmatpush1.bf16.msra.mxu1 %v2911_v33  ;;  %1878 = vmatpush1.bf16.msra.mxu0 %v2914_v35  ;;  %v3602_v45 = vsel %vm545_vm0, %v554_v36, %v556_v42  ;;  %v3606_v46 = vsel %vm545_vm0, %v556_v42, %v554_v36  ;;  %v573_v47 = vpack.c.bf16 %v511_v43, %v509_v37  ;;  %v2968_v33 = vld [vmem:[%s4151_s3 + $0x3b0] ss:$8 sps:$4 sm:$0xff]   ;;  %v2973_v36 = vld [vmem:[%s4151_s3 + $0x284] ss:$8 sps:$4 sm:$0xff]   ;;  %v526_v42 = vand.u32 7, %v514_v23 }
 0x110   : > { %1840 = vmatprep.subr.bf16.mxu1 %v2919_v40  ;;  %1879 = vmatprep.subr.bf16.mxu0 %v2922_v41  ;;  %v2698_v50 = vpack.c.bf16 %v3602_v45, %v3606_v46  ;;  %v3717_v35 = vadd.f32 %v3526_v7, %v3487_v31  ;;  %v2976_v40 = vld [vmem:[%s4151_s3 + $0x3a4] ss:$8 sps:$4 sm:$0xff]   ;;  %v519_v41 = vand.u32 7, %v3472_v25  ;;  %v544_v31 = vrot.slane %v507_v16, 7  ;;  %v2971_v7 = vld [vmem:[%s4151_s3 + $0x280] ss:$8 sps:$4 sm:$0xff]  }
 0x111   : > { %1903 = vmatprep.mubr.bf16.mxu0 %v573_v47  ;;  %vm2752_vm1 = vcmp.ne.s32.totalorder %v526_v42, 0  ;;  %v3022_v23 = vld [vmem:[%s4151_s3 + $0x520] ss:$8 sps:$4 sm:$0xff]   ;;  %v3036_v42 = vld [vmem:[%s4151_s3 + $0x504] ss:$8 sps:$4 sm:$0xff]  }
 0x112   : > { %v506_v47 = vmax.f32 %v3717_v35, 0.0  ;;  %vm2753_vm2 = vcmp.ne.s32.totalorder %v519_v41, 0  ;;  %v547_v12 = vsel %vm545_vm0, %v542_v58, %v544_v31  ;;  %v549_v16 = vsel %vm545_vm0, %v544_v31, %v542_v58  ;;  %v3033_v41 = vld [vmem:[%s4151_s3 + $0x4e4] ss:$8 sps:$4 sm:$0xff]   ;;  %v3031_v58 = vld [vmem:[%s4151_s3 + $0x4e0] ss:$8 sps:$4 sm:$0xff]  }
 0x113   : > { %1841 = vmatpush1.bf16.msra.mxu1 %v2917_v30  ;;  %1880 = vmatpush1.bf16.msra.mxu0 %v2920_v44  ;;  %v2974_v30 = vld [vmem:[%s4151_s3 + $0x3a0] ss:$8 sps:$4 sm:$0xff]   ;;  %v504_v44 = vmax.f32 %v3713_v34, 0.0  ;;  %vm3761_vm3 = vmpackc.low %vm2752_vm1, %vm2753_vm2  ;;  %v3075_v34 = vld [vmem:[%s4151_s3 + $0x594] ss:$8 sps:$4 sm:$0xff]  }
 0x114   : > { %1842 = vmatprep.subr.bf16.mxu1 %v2925_v48  ;;  %1881 = vmatprep.subr.bf16.mxu0 %v2928_v49  ;;  %v2977_v48 = vld [vmem:[%s4151_s3 + $0x390] ss:$8 sps:$4 sm:$0xff]   ;;  %v3034_v31 = vld [vmem:[%s4151_s3 + $0x500] ss:$8 sps:$4 sm:$0xff]  }
 0x115   : > { %v2980_v49 = vld [vmem:[%s4151_s3 + $0x470] ss:$8 sps:$4 sm:$0xff]   ;;  %v3076_v25 = vld [vmem:[%s4151_s3 + $0x580] ss:$8 sps:$4 sm:$0xff]  }
 0x116   : > { %v3082_v45 = vld [vmem:[%s4153_s5 + $0x60] ss:$8 sps:$4 sm:$0xff]   ;;  %v3103_v46 = vld [vmem:[%s4153_s5 + $0x170] ss:$8 sps:$4 sm:$0xff]  }
 0x117   : > { %1843 = vmatpush1.bf16.msra.mxu1 %v2923_v51  ;;  %1882 = vmatpush1.bf16.msra.mxu0 %v2926_v52  ;;  %v570_v51 = vpack.c.bf16 %v506_v47, %v504_v44  ;;  %v2985_v52 = vld [vmem:[%s4151_s3 + $0x384] ss:$8 sps:$4 sm:$0xff]  }
 0x118   : > { %1844 = vmatprep.subr.bf16.mxu1 %v2931_v53  ;;  %1883 = vmatprep.subr.bf16.mxu0 %v2934_v54  ;;  %v2988_v54 = vld [vmem:[%s4151_s3 + $0x464] ss:$8 sps:$4 sm:$0xff]   ;;  %v3085_v53 = vld [vmem:[%s4153_s5 + $0x50] ss:$8 sps:$4 sm:$0xff]  }
 0x11b   : > { %1845 = vmatpush2.bf16.msra.mxu1 %v2929_v55  ;;  %1884 = vmatpush1.bf16.msra.mxu0 %v2932_v56  ;;  %v2683_v55 = vpack.c.bf16 %v547_v12, %v549_v16  ;;  %v555_v56 = vrot.slane %v509_v37, 7  ;;  %v2994_v37 = vld [vmem:[%s4151_s3 + $0x574] ss:$8 sps:$4 sm:$0xff]   ;;  %v3045_v12 = vld [vmem:[%s4151_s3 + $0x4c4] ss:$8 sps:$4 sm:$0xff]  }
 0x11c   : > { %1846 = vmatprep.subr.bf16.mxu1 %v2937_v57  ;;  %1885 = vmatprep.subr.bf16.mxu0 %v2940_v59  ;;  %v557_v57 = vrot.slane %v511_v43, 7  ;;  %v2983_v59 = vld [vmem:[%s4151_s3 + $0x380] ss:$8 sps:$4 sm:$0xff]   ;;  %v3048_v16 = vld [vmem:[%s4151_s3 + $0x5e4] ss:$8 sps:$4 sm:$0xff]  }
 0x11e   : > { %v559_v39 = vsel %vm545_vm0, %v555_v56, %v557_v57  ;;  %v561_v43 = vsel %vm545_vm0, %v557_v57, %v555_v56  ;;  %v3057_v56 = vld [vmem:[%s4151_s3 + $0x4a4] ss:$8 sps:$4 sm:$0xff]  }
 0x11f   : > { %1847 = vmatpush2.bf16.msra.mxu1 %v2935_v60  ;;  %1886 = vmatpush1.bf16.msra.mxu0 %v2938_v61  ;;  %v2986_v60 = vld [vmem:[%s4151_s3 + $0x460] ss:$8 sps:$4 sm:$0xff]   ;;  %v2989_v61 = vld [vmem:[%s4151_s3 + $0x450] ss:$8 sps:$4 sm:$0xff]   ;;  %v3060_v57 = vld [vmem:[%s4151_s3 + $0x5c4] ss:$8 sps:$4 sm:$0xff]  }
 0x120   : > { %1848 = vmatprep.subr.bf16.mxu1 %v2943_v62  ;;  %1887 = vmatprep.subr.bf16.mxu0 %v2946_v63  ;;  %v2992_v62 = vld [vmem:[%s4151_s3 + $0x570] ss:$8 sps:$4 sm:$0xff]   ;;  %v572_v63 = vpack.c.bf16 %v510_v38, %v508_v24  ;;  %v2998_v24 = vld [vmem:[%s4151_s3 + $0x560] ss:$8 sps:$4 sm:$0xff]   ;;  %v3006_v38 = vld [vmem:[%s4151_s3 + $0x554] ss:$8 sps:$4 sm:$0xff]  }
 0x123   : > { %1849 = vmatpush2.bf16.msra.mxu1 %v2941_v0  ;;  %1888 = vmatpush2.bf16.msra.mxu0 %v2944_v1  ;;  %v2997_v0 = vld [vmem:[%s4151_s3 + $0x444] ss:$8 sps:$4 sm:$0xff]  }
 0x124   : > { %1850 = vmatprep.subr.bf16.mxu1 %v2949_v4  ;;  %1889 = vmatprep.subr.bf16.mxu0 %v2952_v5  ;;  %v3000_v1 = vld [vmem:[%s4151_s3 + $0x564] ss:$8 sps:$4 sm:$0xff]   ;;  %v2693_v4 = vpack.c.bf16 %v559_v39, %v561_v43  ;;  %v3001_v5 = vld [vmem:[%s4151_s3 + $0x430] ss:$8 sps:$4 sm:$0xff]  }
 0x125   : > { %v3061_v39 = vld [vmem:[%s4151_s3 + $0x490] ss:$8 sps:$4 sm:$0xff]  }
 0x126   : > { %v3064_v43 = vld [vmem:[%s4151_s3 + $0x5b0] ss:$8 sps:$4 sm:$0xff]  }
 0x127   : > { %1851 = vmatpush2.bf16.msra.mxu1 %v2947_v6  ;;  %1890 = vmatpush2.bf16.msra.mxu0 %v2950_v8  ;;  %v3004_v6 = vld [vmem:[%s4151_s3 + $0x550] ss:$8 sps:$4 sm:$0xff]   ;;  %v3009_v8 = vld [vmem:[%s4151_s3 + $0x424] ss:$8 sps:$4 sm:$0xff]  }
 0x128   : > { %1852 = vmatprep.subr.bf16.mxu1 %v2955_v9  ;;  %1891 = vmatprep.subr.bf16.mxu0 %v2958_v10  ;;  %v3012_v9 = vld [vmem:[%s4151_s3 + $0x544] ss:$8 sps:$4 sm:$0xff]   ;;  %v3007_v10 = vld [vmem:[%s4151_s3 + $0x420] ss:$8 sps:$4 sm:$0xff]  }
 0x12b   : > { %1853 = vmatpush2.bf16.msra.mxu1 %v2953_v13  ;;  %1892 = vmatpush2.bf16.msra.mxu0 %v2956_v14  ;;  %v3010_v13 = vld [vmem:[%s4151_s3 + $0x540] ss:$8 sps:$4 sm:$0xff]   ;;  %v3015_v14 = vld [vmem:[%s4151_s3 + $0x414] ss:$8 sps:$4 sm:$0xff]  }
 0x12c   : > { %1854 = vmatprep.subr.bf16.mxu1 %v2961_v15  ;;  %1893 = vmatprep.subr.bf16.mxu0 %v2964_v18  ;;  %v3018_v15 = vld [vmem:[%s4151_s3 + $0x534] ss:$8 sps:$4 sm:$0xff]   ;;  %v3013_v18 = vld [vmem:[%s4151_s3 + $0x410] ss:$8 sps:$4 sm:$0xff]  }
 0x12f   : > { %1855 = vmatpush2.bf16.msra.mxu1 %v2959_v19  ;;  %1894 = vmatpush2.bf16.msra.mxu0 %v2962_v20  ;;  %v3016_v19 = vld [vmem:[%s4151_s3 + $0x530] ss:$8 sps:$4 sm:$0xff]   ;;  %v3021_v20 = vld [vmem:[%s4151_s3 + $0x404] ss:$8 sps:$4 sm:$0xff]  }
 0x130   : > { %1856 = vmatprep.subr.bf16.mxu1 %v2967_v21  ;;  %1895 = vmatprep.subr.bf16.mxu0 %v2970_v22  ;;  %v3024_v21 = vld [vmem:[%s4151_s3 + $0x524] ss:$8 sps:$4 sm:$0xff]   ;;  %v3019_v22 = vld [vmem:[%s4151_s3 + $0x400] ss:$8 sps:$4 sm:$0xff]  }
 0x133   : > { %1857 = vmatpush2.bf16.msra.mxu1 %v2965_v29  ;;  %1896 = vmatpush2.bf16.msra.mxu0 %v2968_v33  ;;  %v3027_v29 = vld [vmem:[%s4151_s3 + $0x4f4] ss:$8 sps:$4 sm:$0xff]  }
 0x134   : > { %1858 = vmatprep.subr.bf16.mxu1 %v2973_v36  ;;  %1897 = vmatprep.subr.bf16.mxu0 %v2976_v40  ;;  %v3030_v33 = vld [vmem:[%s4151_s3 + $0x514] ss:$8 sps:$4 sm:$0xff]   ;;  %v3025_v36 = vld [vmem:[%s4151_s3 + $0x4f0] ss:$8 sps:$4 sm:$0xff]  }
 0x135   : > { %v3028_v40 = vld [vmem:[%s4151_s3 + $0x510] ss:$8 sps:$4 sm:$0xff]  }
 0x137   : > { %1859 = vmatpush2.bf16.msra.mxu1 %v2971_v7  ;;  %1898 = vmatpush2.bf16.msra.mxu0 %v2974_v30  ;;  %v3039_v7 = vld [vmem:[%s4151_s3 + $0x4d4] ss:$8 sps:$4 sm:$0xff]  }
 0x138   : > { %1899 = vmatprep.subr.bf16.mxu0 %v2979_v3  ;;  %1914 = vmatprep.subr.bf16.mxu1 %v2982_v11  ;;  %v3042_v30 = vld [vmem:[%s4151_s3 + $0x5f4] ss:$8 sps:$4 sm:$0xff]   ;;  %v3037_v3 = vld [vmem:[%s4151_s3 + $0x4d0] ss:$8 sps:$4 sm:$0xff]  }
 0x139   : > { %v3040_v11 = vld [vmem:[%s4151_s3 + $0x5f0] ss:$8 sps:$4 sm:$0xff]  }
 0x13a   : > { %1861 = vmatmul.mubr.bf16.vlgmr.msra.gmra.mxu1 %v570_v51  ;;  %v3051_v51 = vld [vmem:[%s4151_s3 + $0x4b4] ss:$8 sps:$4 sm:$0xff]  }
 0x13b   : > { %1900 = vmatpush2.bf16.msra.mxu0 %v2977_v48  ;;  %1915 = vmatpush1.bf16.msra.mxu1 %v2980_v49  ;;  %v3043_v48 = vld [vmem:[%s4151_s3 + $0x4c0] ss:$8 sps:$4 sm:$0xff]  }
 0x13c   : > { %2684 = vmatprep.mubr.msk.bf16.mxu1 %vm3761_vm3, %v2683_v55  ;;  %1901 = vmatprep.subr.bf16.mxu0 %v2985_v52  ;;  %v3046_v49 = vld [vmem:[%s4151_s3 + $0x5e0] ss:$8 sps:$4 sm:$0xff]   ;;  %v3054_v52 = vld [vmem:[%s4151_s3 + $0x5d4] ss:$8 sps:$4 sm:$0xff]   ;;  %v3052_v55 = vld [vmem:[%s4151_s3 + $0x5d0] ss:$8 sps:$4 sm:$0xff]  }
 0x13d   : > { %1916 = vmatprep.subr.bf16.mxu1 %v2988_v54  ;;  %v3049_v54 = vld [vmem:[%s4151_s3 + $0x4b0] ss:$8 sps:$4 sm:$0xff]  }
 0x13f   : > { %1902 = vmatpush2.bf16.msra.mxu0 %v2983_v59  ;;  %1917 = vmatpush1.bf16.msra.mxu1 %v2986_v60  ;;  %v3055_v59 = vld [vmem:[%s4151_s3 + $0x4a0] ss:$8 sps:$4 sm:$0xff]  }
 0x140   : > { %1918 = vmatprep.subr.bf16.mxu1 %v2991_v28  ;;  %1957 = vmatprep.subr.bf16.mxu0 %v2994_v37  ;;  %v3058_v60 = vld [vmem:[%s4151_s3 + $0x5c0] ss:$8 sps:$4 sm:$0xff]   ;;  %v3063_v28 = vld [vmem:[%s4151_s3 + $0x494] ss:$8 sps:$4 sm:$0xff]  }
 0x141   : > { %v3066_v37 = vld [vmem:[%s4151_s3 + $0x5b4] ss:$8 sps:$4 sm:$0xff]  }
 0x142   : > { %1904 = vmatmul.mubr.bf16.vlgmr.msra.gmra.mxu0 %v572_v63  ;;  %v541_v63 = vrot.slane %v504_v44, 7 }
 0x143   : > { %1919 = vmatpush1.bf16.msra.mxu1 %v2989_v61  ;;  %1958 = vmatpush1.bf16.msra.mxu0 %v2992_v62  ;;  %v3069_v61 = vld [vmem:[%s4151_s3 + $0x484] ss:$8 sps:$4 sm:$0xff]  }
 0x144   : > { %2694 = vmatprep.mubr.msk.bf16.mxu0 %vm3761_vm3, %v2693_v4  ;;  %1920 = vmatprep.subr.bf16.mxu1 %v2997_v0  ;;  %v3072_v62 = vld [vmem:[%s4151_s3 + $0x5a4] ss:$8 sps:$4 sm:$0xff]   ;;  %v543_v0 = vrot.slane %v506_v47, 7  ;;  %v3070_v4 = vld [vmem:[%s4151_s3 + $0x5a0] ss:$8 sps:$4 sm:$0xff]  }
 0x145   : > { %1959 = vmatprep.subr.bf16.mxu0 %v3000_v1  ;;  %v3067_v1 = vld [vmem:[%s4151_s3 + $0x480] ss:$8 sps:$4 sm:$0xff]   ;;  %v3073_v47 = vld [vmem:[%s4151_s3 + $0x590] ss:$8 sps:$4 sm:$0xff]  }
 0x146   : > { %v546_v35 = vsel %vm545_vm0, %v541_v63, %v543_v0  ;;  %v548_v44 = vsel %vm545_vm0, %v543_v0, %v541_v63 }
 0x147   : > { %1921 = vmatpush1.bf16.msra.mxu1 %v2995_v17  ;;  %1960 = vmatpush1.bf16.msra.mxu0 %v2998_v24  ;;  %v2688_v17 = vpack.c.bf16 %v546_v35, %v548_v44  ;;  %v3078_v24 = vld [vmem:[%s4151_s3 + $0x584] ss:$8 sps:$4 sm:$0xff]  }
 0x148   : > { %1922 = vmatprep.subr.bf16.mxu1 %v3003_v32  ;;  %1961 = vmatprep.subr.bf16.mxu0 %v3006_v38  ;;  %v3079_v32 = vld [vmem:[%s4153_s5 + $0x70] ss:$8 sps:$4 sm:$0xff]   ;;  %v3081_v38 = vld [vmem:[%s4153_s5 + $0x74] ss:$8 sps:$4 sm:$0xff]  }
 0x14b   : > { %1923 = vmatpush1.bf16.msra.mxu1 %v3001_v5  ;;  %1962 = vmatpush1.bf16.msra.mxu0 %v3004_v6  ;;  %v3084_v5 = vld [vmem:[%s4153_s5 + $0x64] ss:$8 sps:$4 sm:$0xff]  }
 0x14c   : > { %1924 = vmatprep.subr.bf16.mxu1 %v3009_v8  ;;  %1963 = vmatprep.subr.bf16.mxu0 %v3012_v9  ;;  %v3111_v6 = vld [vmem:[%s4153_s5 + $0x164] ss:$8 sps:$4 sm:$0xff]   ;;  %v3109_v9 = vld [vmem:[%s4153_s5 + $0x160] ss:$8 sps:$4 sm:$0xff]  }
 0x14d   : > { %v3090_v8 = vld [vmem:[%s4153_s5 + $0x44] ss:$8 sps:$4 sm:$0xff]  }
 0x14f   : > { %1925 = vmatpush1.bf16.msra.mxu1 %v3007_v10  ;;  %1964 = vmatpush1.bf16.msra.mxu0 %v3010_v13  ;;  %v3117_v10 = vld [vmem:[%s4153_s5 + $0x154] ss:$8 sps:$4 sm:$0xff]   ;;  %v3088_v13 = vld [vmem:[%s4153_s5 + $0x40] ss:$8 sps:$4 sm:$0xff]  }
 0x150   : > { %1926 = vmatprep.subr.bf16.mxu1 %v3015_v14  ;;  %1965 = vmatprep.subr.bf16.mxu0 %v3018_v15  ;;  %v3093_v14 = vld [vmem:[%s4153_s5 + $0x34] ss:$8 sps:$4 sm:$0xff]   ;;  %v3115_v15 = vld [vmem:[%s4153_s5 + $0x150] ss:$8 sps:$4 sm:$0xff]  }
 0x153   : > { %1927 = vmatpush1.bf16.msra.mxu1 %v3013_v18  ;;  %1966 = vmatpush1.bf16.msra.mxu0 %v3016_v19  ;;  %v3123_v18 = vld [vmem:[%s4153_s5 + $0x144] ss:$8 sps:$4 sm:$0xff]   ;;  %v3091_v19 = vld [vmem:[%s4153_s5 + $0x30] ss:$8 sps:$4 sm:$0xff]  }
 0x154   : > { %1928 = vmatprep.subr.bf16.mxu1 %v3021_v20  ;;  %1967 = vmatprep.subr.bf16.mxu0 %v3024_v21  ;;  %v3096_v20 = vld [vmem:[%s4153_s5 + $0x24] ss:$8 sps:$4 sm:$0xff]   ;;  %v3121_v21 = vld [vmem:[%s4153_s5 + $0x140] ss:$8 sps:$4 sm:$0xff]  }
 0x157   : > { %1929 = vmatpush1.bf16.msra.mxu1 %v3019_v22  ;;  %1968 = vmatpush1.bf16.msra.mxu0 %v3022_v23  ;;  %v3094_v22 = vld [vmem:[%s4153_s5 + $0x20] ss:$8 sps:$4 sm:$0xff]   ;;  %v3099_v23 = vld [vmem:[%s4153_s5 + $0x14] ss:$8 sps:$4 sm:$0xff]  }
 0x158   : > { %1930 = vmatprep.subr.bf16.mxu1 %v3027_v29  ;;  %1969 = vmatprep.subr.bf16.mxu0 %v3030_v33  ;;  %v3097_v29 = vld [vmem:[%s4153_s5 + $0x10] ss:$8 sps:$4 sm:$0xff]   ;;  %v3102_v33 = vld [vmem:[%s4153_s5 + $0x4] ss:$8 sps:$4 sm:$0xff]  }
 0x15b   : > { %1931 = vmatpush2.bf16.msra.mxu1 %v3025_v36  ;;  %1970 = vmatpush1.bf16.msra.mxu0 %v3028_v40  ;;  %v3100_v36 = vld [vmem:[%s4153_s5] ss:$8 sps:$4 sm:$0xff]   ;;  %v3108_v40 = vld [vmem:[%s4153_s5 + $0xf4] ss:$8 sps:$4 sm:$0xff]  }
 0x15c   : > { %1932 = vmatprep.subr.bf16.mxu1 %v3033_v41  ;;  %1971 = vmatprep.subr.bf16.mxu0 %v3036_v42  ;;  %v3106_v41 = vld [vmem:[%s4153_s5 + $0xf0] ss:$8 sps:$4 sm:$0xff]   ;;  %v3114_v42 = vld [vmem:[%s4153_s5 + $0xe4] ss:$8 sps:$4 sm:$0xff]  }
 0x15f   : > { %1933 = vmatpush2.bf16.msra.mxu1 %v3031_v58  ;;  %1972 = vmatpush1.bf16.msra.mxu0 %v3034_v31  ;;  %v3112_v58 = vld [vmem:[%s4153_s5 + $0xe0] ss:$8 sps:$4 sm:$0xff]   ;;  %v3120_v31 = vld [vmem:[%s4153_s5 + $0xd4] ss:$8 sps:$4 sm:$0xff]  }
 0x160   : > { %1934 = vmatprep.subr.bf16.mxu1 %v3039_v7  ;;  %1973 = vmatprep.subr.bf16.mxu0 %v3042_v30  ;;  %v3118_v7 = vld [vmem:[%s4153_s5 + $0xd0] ss:$8 sps:$4 sm:$0xff]   ;;  %v3126_v30 = vld [vmem:[%s4153_s5 + $0xc4] ss:$8 sps:$4 sm:$0xff]  }
 0x163   : > { %1935 = vmatpush2.bf16.msra.mxu1 %v3037_v3  ;;  %1974 = vmatpush2.bf16.msra.mxu0 %v3040_v11  ;;  %v3129_v3 = vld [vmem:[%s4153_s5 + $0x134] ss:$8 sps:$4 sm:$0xff]   ;;  %v3124_v11 = vld [vmem:[%s4153_s5 + $0xc0] ss:$8 sps:$4 sm:$0xff]  }
 0x164   : > { %1936 = vmatprep.subr.bf16.mxu1 %v3045_v12  ;;  %1975 = vmatprep.subr.bf16.mxu0 %v3048_v16  ;;  %v3127_v12 = vld [vmem:[%s4153_s5 + $0x130] ss:$8 sps:$4 sm:$0xff]   ;;  %v3132_v16 = vld [vmem:[%s4153_s5 + $0xb4] ss:$8 sps:$4 sm:$0xff]  }
 0x167   : > { %1937 = vmatpush2.bf16.msra.mxu1 %v3043_v48  ;;  %1976 = vmatpush2.bf16.msra.mxu0 %v3046_v49  ;;  %v3135_v48 = vld [vmem:[%s4153_s5 + $0x124] ss:$8 sps:$4 sm:$0xff]   ;;  %v3130_v49 = vld [vmem:[%s4153_s5 + $0xb0] ss:$8 sps:$4 sm:$0xff]  }
 0x168   : > { %1938 = vmatprep.subr.bf16.mxu1 %v3051_v51  ;;  %1977 = vmatprep.subr.bf16.mxu0 %v3054_v52  ;;  %v3133_v51 = vld [vmem:[%s4153_s5 + $0x120] ss:$8 sps:$4 sm:$0xff]   ;;  %v3138_v52 = vld [vmem:[%s4153_s5 + $0xa4] ss:$8 sps:$4 sm:$0xff]  }
 0x16b   : > { %1939 = vmatpush2.bf16.msra.mxu1 %v3049_v54  ;;  %1978 = vmatpush2.bf16.msra.mxu0 %v3052_v55  ;;  %v3141_v54 = vld [vmem:[%s4153_s5 + $0x114] ss:$8 sps:$4 sm:$0xff]   ;;  %v3136_v55 = vld [vmem:[%s4153_s5 + $0xa0] ss:$8 sps:$4 sm:$0xff]  }
 0x16c   : > { %1940 = vmatprep.subr.bf16.mxu1 %v3057_v56  ;;  %1979 = vmatprep.subr.bf16.mxu0 %v3060_v57  ;;  %v3139_v56 = vld [vmem:[%s4153_s5 + $0x110] ss:$8 sps:$4 sm:$0xff]   ;;  %v3144_v57 = vld [vmem:[%s4153_s5 + $0x94] ss:$8 sps:$4 sm:$0xff]  }
 0x16f   : > { %1941 = vmatpush2.bf16.msra.mxu1 %v3055_v59  ;;  %1980 = vmatpush2.bf16.msra.mxu0 %v3058_v60  ;;  %v3147_v59 = vld [vmem:[%s4153_s5 + $0x104] ss:$8 sps:$4 sm:$0xff]   ;;  %v3142_v60 = vld [vmem:[%s4153_s5 + $0x90] ss:$8 sps:$4 sm:$0xff]  }
 0x170   : > { %1942 = vmatprep.subr.bf16.mxu1 %v3063_v28  ;;  %1981 = vmatprep.subr.bf16.mxu0 %v3066_v37  ;;  %v3145_v28 = vld [vmem:[%s4153_s5 + $0x100] ss:$8 sps:$4 sm:$0xff]   ;;  %v3150_v37 = vld [vmem:[%s4153_s5 + $0x84] ss:$8 sps:$4 sm:$0xff]  }
 0x173   : > { %1943 = vmatpush2.bf16.msra.mxu1 %v3061_v39  ;;  %1982 = vmatpush2.bf16.msra.mxu0 %v3064_v43  ;;  %v3148_v39 = vld [vmem:[%s4153_s5 + $0x80] ss:$8 sps:$4 sm:$0xff]  }
 0x174   : > { %1944 = vmatprep.subr.bf16.mxu1 %v3069_v61  ;;  %1983 = vmatprep.subr.bf16.mxu0 %v3072_v62  ;;  %v3151_v43 = vld [vmem:[%s3238_s21] sm:$0xff]   ;;  %s2465_s21 = sshll.u32 %s3207_s25, 1 }
 0x175   : > { %p276_p4 = scmp.lt.s32.totalorder %s2465_s21, 3 }
 0x177   : > { %1945 = vmatpush2.bf16.msra.mxu1 %v3067_v1  ;;  %1984 = vmatpush2.bf16.msra.mxu0 %v3070_v4  ;;  %s4159_s21 = smov (!%p276_p4, %s2465_s21), 3 }
 0x178   : > { %1985 = vmatprep.subr.bf16.mxu0 %v3075_v34  ;;  %2306 = vmatprep.subr.bf16.mxu1 %v3081_v38  ;;  %s2751_s28 = sshll.u32 %s4159_s21, 4 }
 0x179   : > { %s280_s30 = scalar_lea.vmem %s4155_s7, %s2751_s28 }
 0x17a   : > { %2689 = vmatmul.mubr.msk.bf16.vlgmr.msra.gmra.mxu1 %vm3761_vm3, %v2688_v17 }
 0x17b   : > { %1986 = vmatpush2.bf16.msra.mxu0 %v3073_v47  ;;  %2307 = vmatpush1.bf16.msra.mxu1 %v3079_v32 }
 0x17c   : > { %1987 = vmatprep.subr.bf16.mxu0 %v3078_v24  ;;  %2308 = vmatprep.subr.bf16.mxu1 %v3084_v5 }
 0x17f   : > { %1988 = vmatpush2.bf16.msra.mxu0 %v3076_v25  ;;  %2309 = vmatpush1.bf16.msra.mxu1 %v3082_v45  ;;  %v770_v25 = vld [vmem:[%s4152_s4] sm:$0x3] }
 0x180   : > { %v779_v5 = vrot.slane %v770_v25, %v3475_v26  ;;  %v775_v45 = vrot.slane %v770_v25, %v3478_v27 }
 0x182   : > { %2699 = vmatmul.mubr.msk.bf16.vlgmr.msra.gmra.mxu0 %vm3761_vm3, %v2698_v50  ;;  %v3105_v50 = vld [vmem:[%s4153_s5 + $0x174] ss:$8 sps:$4 sm:$0xff]  }
 0x183   : > { %2381 = vmatprep.mubr.bf16.mxu0 %v3160_v2  ;;  %v3087_v2 = vld [vmem:[%s4153_s5 + $0x54] ss:$8 sps:$4 sm:$0xff]   ;;  %2349 = vmatprep.subr.bf16.mxu0 %v3105_v50 }
 0x184   : > { %2310 = vmatprep.subr.bf16.mxu1 %v3087_v2  ;;  %2350 = vmatpush1.bf16.msra.mxu0 %v3103_v46 }
 0x185   : > { %2351 = vmatprep.subr.bf16.mxu0 %v3111_v6  ;;  %2311 = vmatpush1.bf16.msra.mxu1 %v3085_v53 }
 0x186   : > { %2312 = vmatprep.subr.bf16.mxu1 %v3090_v8 }
 0x188   : > { %2352 = vmatpush1.bf16.msra.mxu0 %v3109_v9 }
 0x189   : > { %2353 = vmatprep.subr.bf16.mxu0 %v3117_v10  ;;  %2313 = vmatpush1.bf16.msra.mxu1 %v3088_v13 }
 0x18a   : > { %2314 = vmatprep.subr.bf16.mxu1 %v3093_v14 }
 0x18c   : > { %2354 = vmatpush1.bf16.msra.mxu0 %v3115_v15 }
 0x18d   : > { %2355 = vmatprep.subr.bf16.mxu0 %v3123_v18  ;;  %2315 = vmatpush1.bf16.msra.mxu1 %v3091_v19 }
 0x18e   : > { %2316 = vmatprep.subr.bf16.mxu1 %v3096_v20 }
 0x190   : > { %2356 = vmatpush1.bf16.msra.mxu0 %v3121_v21 }
 0x191   : > { %2317 = vmatpush1.bf16.msra.mxu1 %v3094_v22  ;;  %2357 = vmatprep.subr.bf16.mxu0 %v3129_v3 }
 0x192   : > { %2318 = vmatprep.subr.bf16.mxu1 %v3099_v23 }
 0x194   : > { %2358 = vmatpush1.bf16.msra.mxu0 %v3127_v12 }
 0x195   : > { %2319 = vmatpush1.bf16.msra.mxu1 %v3097_v29  ;;  %2359 = vmatprep.subr.bf16.mxu0 %v3135_v48 }
 0x196   : > { %2320 = vmatprep.subr.bf16.mxu1 %v3102_v33 }
 0x198   : > { %2360 = vmatpush1.bf16.msra.mxu0 %v3133_v51 }
 0x199   : > { %2321 = vmatpush1.bf16.msra.mxu1 %v3100_v36  ;;  %2361 = vmatprep.subr.bf16.mxu0 %v3141_v54 }
 0x19a   : > { %2322 = vmatprep.subr.bf16.mxu1 %v3108_v40 }
 0x19c   : > { %2362 = vmatpush1.bf16.msra.mxu0 %v3139_v56 }
 0x19d   : > { %2323 = vmatpush2.bf16.msra.mxu1 %v3106_v41  ;;  %2363 = vmatprep.subr.bf16.mxu0 %v3147_v59 }
 0x19e   : > { %2324 = vmatprep.subr.bf16.mxu1 %v3114_v42 }
 0x1a0   : > { %2364 = vmatpush1.bf16.msra.mxu0 %v3145_v28 }
 0x1a1   : > { %2325 = vmatpush2.bf16.msra.mxu1 %v3112_v58 }
 0x1a2   : > { %2326 = vmatprep.subr.bf16.mxu1 %v3120_v31 }
 0x1a3   : > { %2382 = vmatmul.mubr.bf16.vlgmr.msra.gmra.mxu0 %v3151_v43 }
 0x1a5   : > { %2327 = vmatpush2.bf16.msra.mxu1 %v3118_v7 }
 0x1a6   : > { %2328 = vmatprep.subr.bf16.mxu1 %v3126_v30 }
 0x1a9   : > { %2329 = vmatpush2.bf16.msra.mxu1 %v3124_v11 }
 0x1aa   : > { %2330 = vmatprep.subr.bf16.mxu1 %v3132_v16 }
 0x1ad   : > { %2331 = vmatpush2.bf16.msra.mxu1 %v3130_v49 }
 0x1ae   : > { %2332 = vmatprep.subr.bf16.mxu1 %v3138_v52 }
 0x1b1   : > { %2333 = vmatpush2.bf16.msra.mxu1 %v3136_v55 }
 0x1b2   : > { %2334 = vmatprep.subr.bf16.mxu1 %v3144_v57 }
 0x1b5   : > { %2335 = vmatpush2.bf16.msra.mxu1 %v3142_v60  ;;  %v2054_v60 = vld [vmem:[%s4154_s6] sm:$0x3] }
 0x1b6   : > { %2336 = vmatprep.subr.bf16.mxu1 %v3150_v37  ;;  %v2059_v37 = vrot.slane %v2054_v60, %v3478_v27 }
 0x1b9   : > { %2337 = vmatpush2.bf16.msra.mxu1 %v3148_v39  ;;  %v2063_v39 = vrot.slane %v2054_v60, %v3475_v26 }
 0x1ba   : > { %v1776_v61 = vpop.f32.mrf.mxu1 }
 0x1bb   : > { %v1777_v8 = vadd.f32 %v1776_v61, %v775_v45 }
 0x1bc   : > { %v1778_v62 = vpop.f32.mrf.mxu1 }
 0x1bd   : > { %v1779_v53 = vadd.f32 %v1778_v62, %v779_v5 }
 0x1be   : > { %v1780_v63 = vpop.f32.mrf.mxu1 }
 0x1bf   : > { %v1781_v6 = vadd.f32 %v1780_v63, %v775_v45 }
 0x1c0   : > { %v1782_v1 = vpop.f32.mrf.mxu1 }
 0x1c1   : > { %v1783_v9 = vadd.f32 %v1782_v1, %v779_v5 }
 0x1c2   : > { %v1819_v0 = vpop.f32.mrf.mxu0 }
 0x1c3   : > { %v1820_v14 = vadd.f32 %v1819_v0, %v1777_v8 }
 0x1c4   : > { %v1821_v4 = vpop.f32.mrf.mxu0 }
 0x1c5   : > { %v1822_v10 = vadd.f32 %v1821_v4, %v1779_v53 }
 0x1c6   : > { %v1823_v35 = vpop.f32.mrf.mxu0 }
 0x1c7   : > { %v1824_v13 = vadd.f32 %v1823_v35, %v1781_v6 }
 0x1c8   : > { %v1825_v47 = vpop.f32.mrf.mxu0 }
 0x1c9   : > { %v1826_v19 = vadd.f32 %v1825_v47, %v1783_v9 }
 0x1fa   : > { %v1862_v34 = vpop.f32.mrf.mxu1 }
 0x1fb   : > { %v1863_v22 = vadd.f32 %v1862_v34, %v1820_v14 }
 0x1fc   : > { %v1864_v44 = vpop.f32.mrf.mxu1 }
 0x1fd   : > { %v1865_v20 = vadd.f32 %v1864_v44, %v1822_v10 }
 0x1fe   : > { %v1866_v17 = vpop.f32.mrf.mxu1 }
 0x1ff   : > { %v1867_v21 = vadd.f32 %v1866_v17, %v1824_v13 }
 0x200   : > { %v1868_v32 = vpop.f32.mrf.mxu1 }
 0x201   : > { %v1869_v29 = vadd.f32 %v1868_v32, %v1826_v19 }
 0x202   : > { %v1905_v24 = vpop.f32.mrf.mxu0 }
 0x203   : > { %v1906_v40 = vadd.f32 %v1905_v24, %v1863_v22 }
 0x204   : > { %v1907_v38 = vpop.f32.mrf.mxu0 }
 0x205   : > { %v1908_v33 = vadd.f32 %v1907_v38, %v1865_v20 }
 0x206   : > { %v1909_v46 = vpop.f32.mrf.mxu0 }
 0x207   : > { %v1910_v36 = vadd.f32 %v1909_v46, %v1867_v21 }
 0x208   : > { %v1911_v15 = vpop.f32.mrf.mxu0 }
 0x209   : > { %v1912_v58 = vadd.f32 %v1911_v15, %v1869_v29 }
 0x23a   : > { %v1948_v2 = vpop.f32.mrf.mxu1 }
 0x23b   : > { %v1949_v30 = vadd.f32 %v1948_v2, %v1906_v40 }
 0x23c   : > { %v1950_v50 = vpop.f32.mrf.mxu1 }
 0x23d   : > { %v1951_v31 = vadd.f32 %v1950_v50, %v1908_v33 }
 0x23e   : > { %v1952_v18 = vpop.f32.mrf.mxu1 }
 0x23f   : > { %v1953_v7 = vadd.f32 %v1952_v18, %v1910_v36 }
 0x240   : > { %v1954_v41 = vpop.f32.mrf.mxu1 }
 0x241   : > { %v1955_v11 = vadd.f32 %v1954_v41, %v1912_v58 }
 0x242   : > { %v1991_v23 = vpop.f32.mrf.mxu0 }
 0x243   : > { %v1992_v48 = vadd.f32 %v1991_v23, %v1949_v30 }
 0x244   : > { %v1993_v42 = vpop.f32.mrf.mxu0 }
 0x245   : > { %v1994_v12 = vadd.f32 %v1993_v42, %v1951_v31  ;;  %v2000_v56 = vmax.f32 %v1992_v48, 0.0 }
 0x246   : > { %v1995_v3 = vpop.f32.mrf.mxu0 }
 0x247   : > { %v1996_v16 = vadd.f32 %v1995_v3, %v1953_v7  ;;  %v2001_v54 = vmax.f32 %v1994_v12, 0.0 }
 0x248   : > { %v1997_v49 = vpop.f32.mrf.mxu0 }
 0x249   : > { %v1998_v51 = vadd.f32 %v1997_v49, %v1955_v11  ;;  %v2002_v52 = vmax.f32 %v1996_v16, 0.0 }
 0x24b   : > { %v2003_v55 = vmax.f32 %v1998_v51, 0.0  ;;  %v2004_v59 = vpack.c.bf16 %v2002_v52, %v2000_v56 }
 0x24d   : > { %v2005_v57 = vpack.c.bf16 %v2003_v55, %v2001_v54 }
 0x24f   : > { %2338 = vmatprep.mubr.bf16.mxu1 %v2005_v57 }
 0x250   : > { %2339 = vmatmul.mubr.bf16.vlgmr.msra.gmra.mxu1 %v2004_v59 }
 0x263   : > { %v2383_v28 = vpop.f32.mrf.mxu0 }
 0x265   : > { %v2385_v43 = vpop.f32.mrf.mxu0 }
 0x267   : > { %v2387_v4 = vpop.f32.mrf.mxu0 }
 0x269   : > { %v2389_v25 = vpop.f32.mrf.mxu0 }
 0x310   : > { %v2340_v61 = vpop.f32.mrf.mxu1 }
 0x311   : > { %v2341_v62 = vadd.f32 %v2340_v61, %v2059_v37 }
 0x312   : > { %v2342_v63 = vpop.f32.mrf.mxu1 }
 0x313   : > { %v2384_v0 = vadd.f32 %v2383_v28, %v2341_v62  ;;  %v2343_v1 = vadd.f32 %v2342_v63, %v2063_v39 }
 0x314   : > { %v2344_v34 = vpop.f32.mrf.mxu1 }
 0x315   : > { %v2392_v35 = vmax.f32 %v2384_v0, 0.0  ;;  %v2386_v44 = vadd.f32 %v2385_v43, %v2343_v1  ;;  %v2345_v47 = vadd.f32 %v2344_v34, %v2059_v37 }
 0x316   : > { %v2346_v17 = vpop.f32.mrf.mxu1 }
 0x317   : > { %2396 = vst [vmem:[%s280_s30] sm:$0xff] %v2392_v35  ;;  %v2393_v27 = vmax.f32 %v2386_v44, 0.0  ;;  %v2388_v26 = vadd.f32 %v2387_v4, %v2345_v47  ;;  %v2347_v24 = vadd.f32 %v2346_v17, %v2063_v39 }
 0x319   : > { %2397 = vst [vmem:[%s280_s30 + $0x8] sm:$0xff] %v2393_v27  ;;  %v2394_v32 = vmax.f32 %v2388_v26, 0.0  ;;  %v2390_v38 = vadd.f32 %v2389_v25, %v2347_v24 }
 0x31b   : > { %2398 = vst [vmem:[%s280_s30 + $0x10] sm:$0xff] %v2394_v32  ;;  %v2395_v5 = vmax.f32 %v2390_v38, 0.0 }
 0x31d   : > { %2399 = vst [vmem:[%s280_s30 + $0x18] sm:$0xff] %v2395_v5 }
 0x31e PF: > { %s17_s24 = sadd.s32 1, %s3158_s24  }
 0x31f   : > { %p14_p5 = scmp.ge.s32.totalorder %s17_s24, 4  }
 0x321   :  { %16 = sbr.rel (!%p14_p5) target bundleno = 1 (0x1), region = 78 }

</bundles_post_ra>
